<compile_context>
chip_gen: v5e
topology: v5e:2x2
jax: 0.10.0
libtpu: 0.0.40
codegen_flags: <defaults>
</compile_context>

<pallas_src>
import functools

import jax
import jax.numpy as jnp
from jax.experimental import pallas as pl
from jax.experimental.pallas import tpu as pltpu

SUBLANE = 8
LANE = 128


def gru_head_kernel(x_ref, wih_ref, whh_ref, brzn_ref, bhhn_ref,
                    wo_ref, bo_ref, out_ref, gi_ref, *,
                    seq_len, batch, hidden):
    """Whole forward in one invocation.

    x_ref    : (T*B, I)     time-major, batch-padded inputs (rows t*B..t*B+B-1 = step t)
    wih_ref  : (I, 3H)      W_ih^T, gate order [reset | update | new]
    whh_ref  : (H, 3H)      W_hh^T
    brzn_ref : (1, 3H)      [b_ih_r + b_hh_r, b_ih_z + b_hh_z, b_ih_n]
    bhhn_ref : (1, H)       b_hh_n (scaled by r inside the recurrence)
    wo_ref   : (H, O_pad)   o2o W^T, lane-padded with zeros
    bo_ref   : (1, O_pad)   o2o bias, padded columns = -1e30
    out_ref  : (B, O_pad)   log-probabilities (padded columns are garbage)
    gi_ref   : (T*B, 3H)    VMEM scratch for the hoisted input projection
    """
    T, B, H = seq_len, batch, hidden

    # --- Hoisted input projection: one big matmul for all time steps.
    gi_ref[...] = (jnp.dot(x_ref[...], wih_ref[...],
                           preferred_element_type=jnp.float32)
                   + brzn_ref[...])

    # --- Hoist loop-invariant reads off the serial path.
    whh = whh_ref[...]                                        # (H, 3H)
    bhh_n = jnp.broadcast_to(bhhn_ref[...], (B, H))           # (B, H)

    def step(t, h_prev):
        row = pl.multiple_of(t * B, SUBLANE)
        gi = gi_ref[pl.ds(row, B), :]                         # (B, 3H)
        gh = jnp.dot(h_prev, whh, preferred_element_type=jnp.float32)
        rz = jax.nn.sigmoid(gi[:, :2 * H] + gh[:, :2 * H])    # fused r|z gates
        r = rz[:, :H]
        z = rz[:, H:]
        n = jnp.tanh(gi[:, 2 * H:] + r * (gh[:, 2 * H:] + bhh_n))
        return (1.0 - z) * n + z * h_prev

    h_T = jax.lax.fori_loop(0, T, step, jnp.zeros((B, H), jnp.float32),
                            unroll=True)

    # --- Output head: o2o + log_softmax (dropout = eval-mode identity).
    logits = jnp.dot(h_T, wo_ref[...],
                     preferred_element_type=jnp.float32) + bo_ref[...]
    m = jnp.max(logits, axis=1, keepdims=True)
    s = logits - m
    lse = jnp.log(jnp.sum(jnp.exp(s), axis=1, keepdims=True))
    out_ref[...] = s - lse                                    # log_softmax, dim=1


@jax.jit
def rnn_forward(x, params):
    """x: (B, T, I) float32 (batch_first, like the PyTorch module).

    Returns log_softmax(o2o(h_T)) of shape (B, output_size).
    Dropout is identity (eval mode).
    """
    B, T, I = x.shape
    H = params["whh_t"].shape[0]
    O = params["wo_t"].shape[1]

    # Pad batch to full sublanes; pad output head to full lanes.
    B_pad = max(SUBLANE, ((B + SUBLANE - 1) // SUBLANE) * SUBLANE)
    O_pad = max(LANE, ((O + LANE - 1) // LANE) * LANE)

    x_p = jnp.pad(x, ((0, B_pad - B), (0, 0), (0, 0)))
    # Time-major, flattened: (T, B_pad, I) -> (T*B_pad, I)
    x_flat = jnp.transpose(x_p, (1, 0, 2)).reshape(T * B_pad, I)

    # Lane-dense output head: zero-pad W columns, bias pads get -1e30 so the
    # padded logits' exp() underflows to exactly 0 and real columns are exact.
    wo_p = jnp.pad(params["wo_t"], ((0, 0), (0, O_pad - O)))
    bo_p = jnp.pad(params["bo"], ((0, 0), (0, O_pad - O)),
                   constant_values=jnp.float32(-1e30))

    kernel = functools.partial(gru_head_kernel,
                               seq_len=T, batch=B_pad, hidden=H)

    out = pl.pallas_call(
        kernel,
        out_shape=jax.ShapeDtypeStruct((B_pad, O_pad), jnp.float32),
        scratch_shapes=[pltpu.VMEM((T * B_pad, 3 * H), jnp.float32)],
    )(x_flat, params["wih_t"], params["whh_t"], params["b_rz_n"],
      params["bhh_n"], wo_p, bo_p)
    return out[:B, :O]


def init_params(key, input_size, hidden_size, output_size):
    """Deterministic init matching PyTorch shapes (U(-1/sqrt(H), 1/sqrt(H)))."""
    ks = jax.random.split(key, 6)
    H = hidden_size
    k = 1.0 / jnp.sqrt(jnp.float32(H))
    wih = jax.random.uniform(ks[0], (3 * H, input_size), jnp.float32, -k, k)
    whh = jax.random.uniform(ks[1], (3 * H, H), jnp.float32, -k, k)
    bih = jax.random.uniform(ks[2], (3 * H,), jnp.float32, -k, k)
    bhh = jax.random.uniform(ks[3], (3 * H,), jnp.float32, -k, k)
    wo = jax.random.uniform(ks[4], (output_size, H), jnp.float32, -k, k)
    bo = jax.random.uniform(ks[5], (output_size,), jnp.float32, -k, k)

    # Pre-folded biases: r/z gates take b_ih + b_hh; the new-gate b_hh_n must
    # stay separate (it is scaled by r inside the recurrence).
    b_rz_n = jnp.concatenate([bih[:2 * H] + bhh[:2 * H], bih[2 * H:]])

    return {
        "wih_t": wih.T,                       # (I, 3H)
        "whh_t": whh.T,                       # (H, 3H)
        "bih": bih.reshape(1, -1),            # (1, 3H)  (reference only)
        "bhh": bhh.reshape(1, -1),            # (1, 3H)  (reference only)
        "b_rz_n": b_rz_n.reshape(1, -1),      # (1, 3H)  folded bias for kernel
        "bhh_n": bhh[2 * H:].reshape(1, -1),  # (1, H)   recurrent new-gate bias
        "wo_t": wo.T,                         # (H, O)
        "bo": bo.reshape(1, -1),              # (1, O)
    }


def rnn_reference(x, params):
    """Pure-JAX reference of the PyTorch forward (eval mode), raw biases."""
    B, T, I = x.shape
    H = params["whh_t"].shape[0]
    h = jnp.zeros((B, H), jnp.float32)
    for t in range(T):
        x_t = x[:, t, :]
        gi = x_t @ params["wih_t"] + params["bih"]
        gh = h @ params["whh_t"] + params["bhh"]
        i_r, i_z, i_n = gi[:, :H], gi[:, H:2 * H], gi[:, 2 * H:]
        h_r, h_z, h_n = gh[:, :H], gh[:, H:2 * H], gh[:, 2 * H:]
        r = jax.nn.sigmoid(i_r + h_r)
        z = jax.nn.sigmoid(i_z + h_z)
        n = jnp.tanh(i_n + r * h_n)
        h = (1.0 - z) * n + z * h
    logits = h @ params["wo_t"] + params["bo"]
    return jax.nn.log_softmax(logits, axis=1)


if __name__ == "__main__":
    # TODO(synk): Dropout(0.1) is stochastic in train mode; implemented as
    # eval-mode identity here.
    batch, seq, input_size, hidden_size, output_size = 2, 8, 16, 128, 16

    key = jax.random.PRNGKey(0)
    k_x, k_p = jax.random.split(key)
    x = jax.random.normal(k_x, (batch, seq, input_size), jnp.float32)
    params = init_params(k_p, input_size, hidden_size, output_size)

    out = jax.block_until_ready(rnn_forward(x, params))
    ref = jax.block_until_ready(rnn_reference(x, params))

    assert out.shape == (batch, output_size)
    assert jnp.allclose(out, ref, atol=1e-5, rtol=1e-5), "mismatch vs reference"
    print("KERNEL_OK")
</pallas_src>

<mosaic_0001>
module attributes {stable_mosaic.version = 11 : i64} {
  func.func @gru_head_kernel(%arg0: memref<64x16xf32, #tpu.memory_space<vmem>>, %arg1: memref<16x384xf32, #tpu.memory_space<vmem>>, %arg2: memref<128x384xf32, #tpu.memory_space<vmem>>, %arg3: memref<1x384xf32, #tpu.memory_space<vmem>>, %arg4: memref<1x128xf32, #tpu.memory_space<vmem>>, %arg5: memref<128x128xf32, #tpu.memory_space<vmem>>, %arg6: memref<1x128xf32, #tpu.memory_space<vmem>>, %arg7: memref<8x128xf32, #tpu.memory_space<vmem>>, %arg8: memref<64x384xf32, #tpu.memory_space<vmem>>) attributes {dimension_semantics = [], scalar_prefetch = 0 : i64, scratch_operands = 1 : i64, tpu.core_type = #tpu.core_type<tc>} {
    %c0 = arith.constant 0 : index
    %c0_0 = arith.constant 0 : index
    %0 = vector.load %arg0[%c0, %c0_0] : memref<64x16xf32, #tpu.memory_space<vmem>>, vector<64x16xf32>
    %c0_1 = arith.constant 0 : index
    %c0_2 = arith.constant 0 : index
    %1 = vector.load %arg1[%c0_1, %c0_2] : memref<16x384xf32, #tpu.memory_space<vmem>>, vector<16x384xf32>
    %cst = arith.constant dense<0.000000e+00> : vector<64x384xf32>
    %2 = tpu.matmul %0, %1, %cst {dimension_numbers = #tpu.dot_dimension_numbers<[1], [0], [0], [1], [0, 0, 1, 1], [], []>} : vector<64x16xf32>, vector<16x384xf32>, vector<64x384xf32> -> vector<64x384xf32>
    %c0_3 = arith.constant 0 : index
    %c0_4 = arith.constant 0 : index
    %3 = vector.load %arg3[%c0_3, %c0_4] : memref<1x384xf32, #tpu.memory_space<vmem>>, vector<1x384xf32>
    %4 = vector.broadcast %3 : vector<1x384xf32> to vector<64x384xf32>
    %5 = arith.addf %2, %4 : vector<64x384xf32>
    %c0_5 = arith.constant 0 : index
    %c0_6 = arith.constant 0 : index
    %6 = vector.load %arg8[%c0_5, %c0_6] : memref<64x384xf32, #tpu.memory_space<vmem>>, vector<64x384xf32>
    tpu.vector_store %arg8[%c0_5, %c0_6], %5 {strides = array<i32>} : memref<64x384xf32, #tpu.memory_space<vmem>>, vector<64x384xf32>,
    %c0_7 = arith.constant 0 : index
    %c0_8 = arith.constant 0 : index
    %7 = vector.load %arg2[%c0_7, %c0_8] : memref<128x384xf32, #tpu.memory_space<vmem>>, vector<128x384xf32>
    %c0_9 = arith.constant 0 : index
    %c0_10 = arith.constant 0 : index
    %8 = vector.load %arg4[%c0_9, %c0_10] : memref<1x128xf32, #tpu.memory_space<vmem>>, vector<1x128xf32>
    %9 = vector.shape_cast %8 : vector<1x128xf32> to vector<1x128xf32>
    %10 = vector.broadcast %9 : vector<1x128xf32> to vector<8x128xf32>
    %cst_11 = arith.constant 0.000000e+00 : f32
    %11 = vector.broadcast %cst_11 : f32 to vector<8x128xf32>
    %c0_i32 = arith.constant 0 : i32
    %c8_i32 = arith.constant 8 : i32
    %12 = arith.muli %c0_i32, %c8_i32 : i32
    %13 = tpu.assume_multiple %12, 8 : i32
    %14 = arith.index_cast %13 : i32 to index
    %c0_12 = arith.constant 0 : index
    %15 = vector.load %arg8[%14, %c0_12] : memref<64x384xf32, #tpu.memory_space<vmem>>, vector<8x384xf32>
    %cst_13 = arith.constant dense<0.000000e+00> : vector<8x384xf32>
    %16 = tpu.matmul %11, %7, %cst_13 {dimension_numbers = #tpu.dot_dimension_numbers<[1], [0], [0], [1], [0, 0, 1, 1], [], []>} : vector<8x128xf32>, vector<128x384xf32>, vector<8x384xf32> -> vector<8x384xf32>
    %17 = vector.extract_strided_slice %15 {offsets = [0, 0], sizes = [8, 256], strides = [1, 1]} : vector<8x384xf32> to vector<8x256xf32>
    %18 = vector.extract_strided_slice %16 {offsets = [0, 0], sizes = [8, 256], strides = [1, 1]} : vector<8x384xf32> to vector<8x256xf32>
    %19 = arith.addf %17, %18 : vector<8x256xf32>
    %20 = arith.negf %19 : vector<8x256xf32>
    %21 = math.exp %20 : vector<8x256xf32>
    %cst_14 = arith.constant 1.000000e+00 : f32
    %22 = vector.broadcast %cst_14 : f32 to vector<8x256xf32>
    %23 = arith.addf %22, %21 : vector<8x256xf32>
    %24 = arith.divf %22, %23 : vector<8x256xf32>
    %25 = vector.extract_strided_slice %24 {offsets = [0, 0], sizes = [8, 128], strides = [1, 1]} : vector<8x256xf32> to vector<8x128xf32>
    %26 = vector.extract_strided_slice %24 {offsets = [0, 128], sizes = [8, 128], strides = [1, 1]} : vector<8x256xf32> to vector<8x128xf32>
    %27 = vector.extract_strided_slice %15 {offsets = [0, 256], sizes = [8, 128], strides = [1, 1]} : vector<8x384xf32> to vector<8x128xf32>
    %28 = vector.extract_strided_slice %16 {offsets = [0, 256], sizes = [8, 128], strides = [1, 1]} : vector<8x384xf32> to vector<8x128xf32>
    %29 = arith.addf %28, %10 : vector<8x128xf32>
    %30 = arith.mulf %25, %29 : vector<8x128xf32>
    %31 = arith.addf %27, %30 : vector<8x128xf32>
    %32 = math.tanh %31 : vector<8x128xf32>
    %cst_15 = arith.constant 1.000000e+00 : f32
    %33 = vector.broadcast %cst_15 : f32 to vector<8x128xf32>
    %34 = arith.subf %33, %26 : vector<8x128xf32>
    %35 = arith.mulf %34, %32 : vector<8x128xf32>
    %36 = arith.mulf %26, %11 : vector<8x128xf32>
    %37 = arith.addf %35, %36 : vector<8x128xf32>
    %c1_i32 = arith.constant 1 : i32
    %c8_i32_16 = arith.constant 8 : i32
    %38 = arith.muli %c1_i32, %c8_i32_16 : i32
    %39 = tpu.assume_multiple %38, 8 : i32
    %40 = arith.index_cast %39 : i32 to index
    %c0_17 = arith.constant 0 : index
    %41 = vector.load %arg8[%40, %c0_17] : memref<64x384xf32, #tpu.memory_space<vmem>>, vector<8x384xf32>
    %cst_18 = arith.constant dense<0.000000e+00> : vector<8x384xf32>
    %42 = tpu.matmul %37, %7, %cst_18 {dimension_numbers = #tpu.dot_dimension_numbers<[1], [0], [0], [1], [0, 0, 1, 1], [], []>} : vector<8x128xf32>, vector<128x384xf32>, vector<8x384xf32> -> vector<8x384xf32>
    %43 = vector.extract_strided_slice %41 {offsets = [0, 0], sizes = [8, 256], strides = [1, 1]} : vector<8x384xf32> to vector<8x256xf32>
    %44 = vector.extract_strided_slice %42 {offsets = [0, 0], sizes = [8, 256], strides = [1, 1]} : vector<8x384xf32> to vector<8x256xf32>
    %45 = arith.addf %43, %44 : vector<8x256xf32>
    %46 = arith.negf %45 : vector<8x256xf32>
    %47 = math.exp %46 : vector<8x256xf32>
    %cst_19 = arith.constant 1.000000e+00 : f32
    %48 = vector.broadcast %cst_19 : f32 to vector<8x256xf32>
    %49 = arith.addf %48, %47 : vector<8x256xf32>
    %50 = arith.divf %48, %49 : vector<8x256xf32>
    %51 = vector.extract_strided_slice %50 {offsets = [0, 0], sizes = [8, 128], strides = [1, 1]} : vector<8x256xf32> to vector<8x128xf32>
    %52 = vector.extract_strided_slice %50 {offsets = [0, 128], sizes = [8, 128], strides = [1, 1]} : vector<8x256xf32> to vector<8x128xf32>
    %53 = vector.extract_strided_slice %41 {offsets = [0, 256], sizes = [8, 128], strides = [1, 1]} : vector<8x384xf32> to vector<8x128xf32>
    %54 = vector.extract_strided_slice %42 {offsets = [0, 256], sizes = [8, 128], strides = [1, 1]} : vector<8x384xf32> to vector<8x128xf32>
    %55 = arith.addf %54, %10 : vector<8x128xf32>
    %56 = arith.mulf %51, %55 : vector<8x128xf32>
    %57 = arith.addf %53, %56 : vector<8x128xf32>
    %58 = math.tanh %57 : vector<8x128xf32>
    %cst_20 = arith.constant 1.000000e+00 : f32
    %59 = vector.broadcast %cst_20 : f32 to vector<8x128xf32>
    %60 = arith.subf %59, %52 : vector<8x128xf32>
    %61 = arith.mulf %60, %58 : vector<8x128xf32>
    %62 = arith.mulf %52, %37 : vector<8x128xf32>
    %63 = arith.addf %61, %62 : vector<8x128xf32>
    %c2_i32 = arith.constant 2 : i32
    %c8_i32_21 = arith.constant 8 : i32
    %64 = arith.muli %c2_i32, %c8_i32_21 : i32
    %65 = tpu.assume_multiple %64, 8 : i32
    %66 = arith.index_cast %65 : i32 to index
    %c0_22 = arith.constant 0 : index
    %67 = vector.load %arg8[%66, %c0_22] : memref<64x384xf32, #tpu.memory_space<vmem>>, vector<8x384xf32>
    %cst_23 = arith.constant dense<0.000000e+00> : vector<8x384xf32>
    %68 = tpu.matmul %63, %7, %cst_23 {dimension_numbers = #tpu.dot_dimension_numbers<[1], [0], [0], [1], [0, 0, 1, 1], [], []>} : vector<8x128xf32>, vector<128x384xf32>, vector<8x384xf32> -> vector<8x384xf32>
    %69 = vector.extract_strided_slice %67 {offsets = [0, 0], sizes = [8, 256], strides = [1, 1]} : vector<8x384xf32> to vector<8x256xf32>
    %70 = vector.extract_strided_slice %68 {offsets = [0, 0], sizes = [8, 256], strides = [1, 1]} : vector<8x384xf32> to vector<8x256xf32>
    %71 = arith.addf %69, %70 : vector<8x256xf32>
    %72 = arith.negf %71 : vector<8x256xf32>
    %73 = math.exp %72 : vector<8x256xf32>
    %cst_24 = arith.constant 1.000000e+00 : f32
    %74 = vector.broadcast %cst_24 : f32 to vector<8x256xf32>
    %75 = arith.addf %74, %73 : vector<8x256xf32>
    %76 = arith.divf %74, %75 : vector<8x256xf32>
    %77 = vector.extract_strided_slice %76 {offsets = [0, 0], sizes = [8, 128], strides = [1, 1]} : vector<8x256xf32> to vector<8x128xf32>
    %78 = vector.extract_strided_slice %76 {offsets = [0, 128], sizes = [8, 128], strides = [1, 1]} : vector<8x256xf32> to vector<8x128xf32>
    %79 = vector.extract_strided_slice %67 {offsets = [0, 256], sizes = [8, 128], strides = [1, 1]} : vector<8x384xf32> to vector<8x128xf32>
    %80 = vector.extract_strided_slice %68 {offsets = [0, 256], sizes = [8, 128], strides = [1, 1]} : vector<8x384xf32> to vector<8x128xf32>
    %81 = arith.addf %80, %10 : vector<8x128xf32>
    %82 = arith.mulf %77, %81 : vector<8x128xf32>
    %83 = arith.addf %79, %82 : vector<8x128xf32>
    %84 = math.tanh %83 : vector<8x128xf32>
    %cst_25 = arith.constant 1.000000e+00 : f32
    %85 = vector.broadcast %cst_25 : f32 to vector<8x128xf32>
    %86 = arith.subf %85, %78 : vector<8x128xf32>
    %87 = arith.mulf %86, %84 : vector<8x128xf32>
    %88 = arith.mulf %78, %63 : vector<8x128xf32>
    %89 = arith.addf %87, %88 : vector<8x128xf32>
    %c3_i32 = arith.constant 3 : i32
    %c8_i32_26 = arith.constant 8 : i32
    %90 = arith.muli %c3_i32, %c8_i32_26 : i32
    %91 = tpu.assume_multiple %90, 8 : i32
    %92 = arith.index_cast %91 : i32 to index
    %c0_27 = arith.constant 0 : index
    %93 = vector.load %arg8[%92, %c0_27] : memref<64x384xf32, #tpu.memory_space<vmem>>, vector<8x384xf32>
    %cst_28 = arith.constant dense<0.000000e+00> : vector<8x384xf32>
    %94 = tpu.matmul %89, %7, %cst_28 {dimension_numbers = #tpu.dot_dimension_numbers<[1], [0], [0], [1], [0, 0, 1, 1], [], []>} : vector<8x128xf32>, vector<128x384xf32>, vector<8x384xf32> -> vector<8x384xf32>
    %95 = vector.extract_strided_slice %93 {offsets = [0, 0], sizes = [8, 256], strides = [1, 1]} : vector<8x384xf32> to vector<8x256xf32>
    %96 = vector.extract_strided_slice %94 {offsets = [0, 0], sizes = [8, 256], strides = [1, 1]} : vector<8x384xf32> to vector<8x256xf32>
    %97 = arith.addf %95, %96 : vector<8x256xf32>
    %98 = arith.negf %97 : vector<8x256xf32>
    %99 = math.exp %98 : vector<8x256xf32>
    %cst_29 = arith.constant 1.000000e+00 : f32
    %100 = vector.broadcast %cst_29 : f32 to vector<8x256xf32>
    %101 = arith.addf %100, %99 : vector<8x256xf32>
    %102 = arith.divf %100, %101 : vector<8x256xf32>
    %103 = vector.extract_strided_slice %102 {offsets = [0, 0], sizes = [8, 128], strides = [1, 1]} : vector<8x256xf32> to vector<8x128xf32>
    %104 = vector.extract_strided_slice %102 {offsets = [0, 128], sizes = [8, 128], strides = [1, 1]} : vector<8x256xf32> to vector<8x128xf32>
    %105 = vector.extract_strided_slice %93 {offsets = [0, 256], sizes = [8, 128], strides = [1, 1]} : vector<8x384xf32> to vector<8x128xf32>
    %106 = vector.extract_strided_slice %94 {offsets = [0, 256], sizes = [8, 128], strides = [1, 1]} : vector<8x384xf32> to vector<8x128xf32>
    %107 = arith.addf %106, %10 : vector<8x128xf32>
    %108 = arith.mulf %103, %107 : vector<8x128xf32>
    %109 = arith.addf %105, %108 : vector<8x128xf32>
    %110 = math.tanh %109 : vector<8x128xf32>
    %cst_30 = arith.constant 1.000000e+00 : f32
    %111 = vector.broadcast %cst_30 : f32 to vector<8x128xf32>
    %112 = arith.subf %111, %104 : vector<8x128xf32>
    %113 = arith.mulf %112, %110 : vector<8x128xf32>
    %114 = arith.mulf %104, %89 : vector<8x128xf32>
    %115 = arith.addf %113, %114 : vector<8x128xf32>
    %c4_i32 = arith.constant 4 : i32
    %c8_i32_31 = arith.constant 8 : i32
    %116 = arith.muli %c4_i32, %c8_i32_31 : i32
    %117 = tpu.assume_multiple %116, 8 : i32
    %118 = arith.index_cast %117 : i32 to index
    %c0_32 = arith.constant 0 : index
    %119 = vector.load %arg8[%118, %c0_32] : memref<64x384xf32, #tpu.memory_space<vmem>>, vector<8x384xf32>
    %cst_33 = arith.constant dense<0.000000e+00> : vector<8x384xf32>
    %120 = tpu.matmul %115, %7, %cst_33 {dimension_numbers = #tpu.dot_dimension_numbers<[1], [0], [0], [1], [0, 0, 1, 1], [], []>} : vector<8x128xf32>, vector<128x384xf32>, vector<8x384xf32> -> vector<8x384xf32>
    %121 = vector.extract_strided_slice %119 {offsets = [0, 0], sizes = [8, 256], strides = [1, 1]} : vector<8x384xf32> to vector<8x256xf32>
    %122 = vector.extract_strided_slice %120 {offsets = [0, 0], sizes = [8, 256], strides = [1, 1]} : vector<8x384xf32> to vector<8x256xf32>
    %123 = arith.addf %121, %122 : vector<8x256xf32>
    %124 = arith.negf %123 : vector<8x256xf32>
    %125 = math.exp %124 : vector<8x256xf32>
    %cst_34 = arith.constant 1.000000e+00 : f32
    %126 = vector.broadcast %cst_34 : f32 to vector<8x256xf32>
    %127 = arith.addf %126, %125 : vector<8x256xf32>
    %128 = arith.divf %126, %127 : vector<8x256xf32>
    %129 = vector.extract_strided_slice %128 {offsets = [0, 0], sizes = [8, 128], strides = [1, 1]} : vector<8x256xf32> to vector<8x128xf32>
    %130 = vector.extract_strided_slice %128 {offsets = [0, 128], sizes = [8, 128], strides = [1, 1]} : vector<8x256xf32> to vector<8x128xf32>
    %131 = vector.extract_strided_slice %119 {offsets = [0, 256], sizes = [8, 128], strides = [1, 1]} : vector<8x384xf32> to vector<8x128xf32>
    %132 = vector.extract_strided_slice %120 {offsets = [0, 256], sizes = [8, 128], strides = [1, 1]} : vector<8x384xf32> to vector<8x128xf32>
    %133 = arith.addf %132, %10 : vector<8x128xf32>
    %134 = arith.mulf %129, %133 : vector<8x128xf32>
    %135 = arith.addf %131, %134 : vector<8x128xf32>
    %136 = math.tanh %135 : vector<8x128xf32>
    %cst_35 = arith.constant 1.000000e+00 : f32
    %137 = vector.broadcast %cst_35 : f32 to vector<8x128xf32>
    %138 = arith.subf %137, %130 : vector<8x128xf32>
    %139 = arith.mulf %138, %136 : vector<8x128xf32>
    %140 = arith.mulf %130, %115 : vector<8x128xf32>
    %141 = arith.addf %139, %140 : vector<8x128xf32>
    %c5_i32 = arith.constant 5 : i32
    %c8_i32_36 = arith.constant 8 : i32
    %142 = arith.muli %c5_i32, %c8_i32_36 : i32
    %143 = tpu.assume_multiple %142, 8 : i32
    %144 = arith.index_cast %143 : i32 to index
    %c0_37 = arith.constant 0 : index
    %145 = vector.load %arg8[%144, %c0_37] : memref<64x384xf32, #tpu.memory_space<vmem>>, vector<8x384xf32>
    %cst_38 = arith.constant dense<0.000000e+00> : vector<8x384xf32>
    %146 = tpu.matmul %141, %7, %cst_38 {dimension_numbers = #tpu.dot_dimension_numbers<[1], [0], [0], [1], [0, 0, 1, 1], [], []>} : vector<8x128xf32>, vector<128x384xf32>, vector<8x384xf32> -> vector<8x384xf32>
    %147 = vector.extract_strided_slice %145 {offsets = [0, 0], sizes = [8, 256], strides = [1, 1]} : vector<8x384xf32> to vector<8x256xf32>
    %148 = vector.extract_strided_slice %146 {offsets = [0, 0], sizes = [8, 256], strides = [1, 1]} : vector<8x384xf32> to vector<8x256xf32>
    %149 = arith.addf %147, %148 : vector<8x256xf32>
    %150 = arith.negf %149 : vector<8x256xf32>
    %151 = math.exp %150 : vector<8x256xf32>
    %cst_39 = arith.constant 1.000000e+00 : f32
    %152 = vector.broadcast %cst_39 : f32 to vector<8x256xf32>
    %153 = arith.addf %152, %151 : vector<8x256xf32>
    %154 = arith.divf %152, %153 : vector<8x256xf32>
    %155 = vector.extract_strided_slice %154 {offsets = [0, 0], sizes = [8, 128], strides = [1, 1]} : vector<8x256xf32> to vector<8x128xf32>
    %156 = vector.extract_strided_slice %154 {offsets = [0, 128], sizes = [8, 128], strides = [1, 1]} : vector<8x256xf32> to vector<8x128xf32>
    %157 = vector.extract_strided_slice %145 {offsets = [0, 256], sizes = [8, 128], strides = [1, 1]} : vector<8x384xf32> to vector<8x128xf32>
    %158 = vector.extract_strided_slice %146 {offsets = [0, 256], sizes = [8, 128], strides = [1, 1]} : vector<8x384xf32> to vector<8x128xf32>
    %159 = arith.addf %158, %10 : vector<8x128xf32>
    %160 = arith.mulf %155, %159 : vector<8x128xf32>
    %161 = arith.addf %157, %160 : vector<8x128xf32>
    %162 = math.tanh %161 : vector<8x128xf32>
    %cst_40 = arith.constant 1.000000e+00 : f32
    %163 = vector.broadcast %cst_40 : f32 to vector<8x128xf32>
    %164 = arith.subf %163, %156 : vector<8x128xf32>
    %165 = arith.mulf %164, %162 : vector<8x128xf32>
    %166 = arith.mulf %156, %141 : vector<8x128xf32>
    %167 = arith.addf %165, %166 : vector<8x128xf32>
    %c6_i32 = arith.constant 6 : i32
    %c8_i32_41 = arith.constant 8 : i32
    %168 = arith.muli %c6_i32, %c8_i32_41 : i32
    %169 = tpu.assume_multiple %168, 8 : i32
    %170 = arith.index_cast %169 : i32 to index
    %c0_42 = arith.constant 0 : index
    %171 = vector.load %arg8[%170, %c0_42] : memref<64x384xf32, #tpu.memory_space<vmem>>, vector<8x384xf32>
    %cst_43 = arith.constant dense<0.000000e+00> : vector<8x384xf32>
    %172 = tpu.matmul %167, %7, %cst_43 {dimension_numbers = #tpu.dot_dimension_numbers<[1], [0], [0], [1], [0, 0, 1, 1], [], []>} : vector<8x128xf32>, vector<128x384xf32>, vector<8x384xf32> -> vector<8x384xf32>
    %173 = vector.extract_strided_slice %171 {offsets = [0, 0], sizes = [8, 256], strides = [1, 1]} : vector<8x384xf32> to vector<8x256xf32>
    %174 = vector.extract_strided_slice %172 {offsets = [0, 0], sizes = [8, 256], strides = [1, 1]} : vector<8x384xf32> to vector<8x256xf32>
    %175 = arith.addf %173, %174 : vector<8x256xf32>
    %176 = arith.negf %175 : vector<8x256xf32>
    %177 = math.exp %176 : vector<8x256xf32>
    %cst_44 = arith.constant 1.000000e+00 : f32
    %178 = vector.broadcast %cst_44 : f32 to vector<8x256xf32>
    %179 = arith.addf %178, %177 : vector<8x256xf32>
    %180 = arith.divf %178, %179 : vector<8x256xf32>
    %181 = vector.extract_strided_slice %180 {offsets = [0, 0], sizes = [8, 128], strides = [1, 1]} : vector<8x256xf32> to vector<8x128xf32>
    %182 = vector.extract_strided_slice %180 {offsets = [0, 128], sizes = [8, 128], strides = [1, 1]} : vector<8x256xf32> to vector<8x128xf32>
    %183 = vector.extract_strided_slice %171 {offsets = [0, 256], sizes = [8, 128], strides = [1, 1]} : vector<8x384xf32> to vector<8x128xf32>
    %184 = vector.extract_strided_slice %172 {offsets = [0, 256], sizes = [8, 128], strides = [1, 1]} : vector<8x384xf32> to vector<8x128xf32>
    %185 = arith.addf %184, %10 : vector<8x128xf32>
    %186 = arith.mulf %181, %185 : vector<8x128xf32>
    %187 = arith.addf %183, %186 : vector<8x128xf32>
    %188 = math.tanh %187 : vector<8x128xf32>
    %cst_45 = arith.constant 1.000000e+00 : f32
    %189 = vector.broadcast %cst_45 : f32 to vector<8x128xf32>
    %190 = arith.subf %189, %182 : vector<8x128xf32>
    %191 = arith.mulf %190, %188 : vector<8x128xf32>
    %192 = arith.mulf %182, %167 : vector<8x128xf32>
    %193 = arith.addf %191, %192 : vector<8x128xf32>
    %c7_i32 = arith.constant 7 : i32
    %c8_i32_46 = arith.constant 8 : i32
    %194 = arith.muli %c7_i32, %c8_i32_46 : i32
    %195 = tpu.assume_multiple %194, 8 : i32
    %196 = arith.index_cast %195 : i32 to index
    %c0_47 = arith.constant 0 : index
    %197 = vector.load %arg8[%196, %c0_47] : memref<64x384xf32, #tpu.memory_space<vmem>>, vector<8x384xf32>
    %cst_48 = arith.constant dense<0.000000e+00> : vector<8x384xf32>
    %198 = tpu.matmul %193, %7, %cst_48 {dimension_numbers = #tpu.dot_dimension_numbers<[1], [0], [0], [1], [0, 0, 1, 1], [], []>} : vector<8x128xf32>, vector<128x384xf32>, vector<8x384xf32> -> vector<8x384xf32>
    %199 = vector.extract_strided_slice %197 {offsets = [0, 0], sizes = [8, 256], strides = [1, 1]} : vector<8x384xf32> to vector<8x256xf32>
    %200 = vector.extract_strided_slice %198 {offsets = [0, 0], sizes = [8, 256], strides = [1, 1]} : vector<8x384xf32> to vector<8x256xf32>
    %201 = arith.addf %199, %200 : vector<8x256xf32>
    %202 = arith.negf %201 : vector<8x256xf32>
    %203 = math.exp %202 : vector<8x256xf32>
    %cst_49 = arith.constant 1.000000e+00 : f32
    %204 = vector.broadcast %cst_49 : f32 to vector<8x256xf32>
    %205 = arith.addf %204, %203 : vector<8x256xf32>
    %206 = arith.divf %204, %205 : vector<8x256xf32>
    %207 = vector.extract_strided_slice %206 {offsets = [0, 0], sizes = [8, 128], strides = [1, 1]} : vector<8x256xf32> to vector<8x128xf32>
    %208 = vector.extract_strided_slice %206 {offsets = [0, 128], sizes = [8, 128], strides = [1, 1]} : vector<8x256xf32> to vector<8x128xf32>
    %209 = vector.extract_strided_slice %197 {offsets = [0, 256], sizes = [8, 128], strides = [1, 1]} : vector<8x384xf32> to vector<8x128xf32>
    %210 = vector.extract_strided_slice %198 {offsets = [0, 256], sizes = [8, 128], strides = [1, 1]} : vector<8x384xf32> to vector<8x128xf32>
    %211 = arith.addf %210, %10 : vector<8x128xf32>
    %212 = arith.mulf %207, %211 : vector<8x128xf32>
    %213 = arith.addf %209, %212 : vector<8x128xf32>
    %214 = math.tanh %213 : vector<8x128xf32>
    %cst_50 = arith.constant 1.000000e+00 : f32
    %215 = vector.broadcast %cst_50 : f32 to vector<8x128xf32>
    %216 = arith.subf %215, %208 : vector<8x128xf32>
    %217 = arith.mulf %216, %214 : vector<8x128xf32>
    %218 = arith.mulf %208, %193 : vector<8x128xf32>
    %219 = arith.addf %217, %218 : vector<8x128xf32>
    %c8_i32_51 = arith.constant 8 : i32
    %c0_52 = arith.constant 0 : index
    %c0_53 = arith.constant 0 : index
    %220 = vector.load %arg5[%c0_52, %c0_53] : memref<128x128xf32, #tpu.memory_space<vmem>>, vector<128x128xf32>
    %cst_54 = arith.constant dense<0.000000e+00> : vector<8x128xf32>
    %221 = tpu.matmul %219, %220, %cst_54 {dimension_numbers = #tpu.dot_dimension_numbers<[1], [0], [0], [1], [0, 0, 1, 1], [], []>} : vector<8x128xf32>, vector<128x128xf32>, vector<8x128xf32> -> vector<8x128xf32>
    %c0_55 = arith.constant 0 : index
    %c0_56 = arith.constant 0 : index
    %222 = vector.load %arg6[%c0_55, %c0_56] : memref<1x128xf32, #tpu.memory_space<vmem>>, vector<1x128xf32>
    %223 = vector.broadcast %222 : vector<1x128xf32> to vector<8x128xf32>
    %224 = arith.addf %221, %223 : vector<8x128xf32>
    %cst_57 = arith.constant dense<0xFF800000> : vector<8xf32>
    %225 = vector.multi_reduction <maximumf>, %224, %cst_57 [1] : vector<8x128xf32> to vector<8xf32>
    %226 = vector.shape_cast %225 : vector<8xf32> to vector<8x1xf32>
    %227 = vector.broadcast %226 : vector<8x1xf32> to vector<8x128xf32>
    %228 = arith.subf %224, %227 : vector<8x128xf32>
    %229 = math.exp %228 : vector<8x128xf32>
    %cst_58 = arith.constant dense<0.000000e+00> : vector<8xf32>
    %230 = vector.multi_reduction <add>, %229, %cst_58 [1] : vector<8x128xf32> to vector<8xf32>
    %231 = vector.shape_cast %230 : vector<8xf32> to vector<8x1xf32>
    %232 = math.log %231 : vector<8x1xf32>
    %233 = vector.broadcast %232 : vector<8x1xf32> to vector<8x128xf32>
    %234 = arith.subf %228, %233 : vector<8x128xf32>
    %c0_59 = arith.constant 0 : index
    %c0_60 = arith.constant 0 : index
    %235 = vector.load %arg7[%c0_59, %c0_60] : memref<8x128xf32, #tpu.memory_space<vmem>>, vector<8x128xf32>
    tpu.vector_store %arg7[%c0_59, %c0_60], %234 {strides = array<i32>} : memref<8x128xf32, #tpu.memory_space<vmem>>, vector<8x128xf32>,
    return
  }
}

</mosaic_0001>

<bundles_post_ra>
// kernel: rnn_forward.1
= control target key start
LH: loop header
LB: loop body
LE: loop exit
PB: predicated region body
PF: predicated region fallthrough
CT: control target
= control target key end

     0   :  { %vm48_vm0 = vcmask 130048   ;;  %v1422_v39 = vmov 0.0   ;;  %s2576_s1 = inlined_call_operand.vmem [shape: f32[16,384], index: 1, kind: input, shape index: {}]   ;;  %s2577_s2 = inlined_call_operand.vmem [shape: f32[128,384], index: 2, kind: input, shape index: {}]   ;;  %s2578_s0 = inlined_call_operand.vmem [shape: f32[64,16], index: 0, kind: input, shape index: {}]   ;;  %s2579_s4 = inlined_call_operand.vmem [shape: f32[1,128], index: 4, kind: input, shape index: {}]   ;;  %s2580_s3 = inlined_call_operand.vmem [shape: f32[1,384], index: 3, kind: input, shape index: {}]   ;;  %s2581_s6 = inlined_call_operand.vmem [shape: f32[1,128], index: 6, kind: input, shape index: {}]   ;;  %s2582_s5 = inlined_call_operand.vmem [shape: f32[128,128], index: 5, kind: input, shape index: {}]   ;;  %s2583_s7 = inlined_call_operand.vmem [shape: f32[8,128], index: 7, kind: output, shape index: {}]  }
   0x1   :  { %v37_v0 = vld [vmem:[%s2576_s1 + $0x18] sm:$0xff]  ;;  %v1469_v1 = vld [vmem:[%s2577_s2 + $0x168] sm:$0xff]  ;;  %v34_v2 = vld [vmem:[%s2576_s1] sm:$0xff] }
   0x2   :  { %87 = vmatpush.msra.mxu0 %v37_v0  ;;  %278 = vmatpush.msra.mxu3 %v1469_v1  ;;  %v1478_v3 = vld [vmem:[%s2577_s2 + $0x150] sm:$0xff]  ;;  %v1483_v4 = vld [vmem:[%s2578_s0] sm:$0xff]  ;;  %v1488_v5 = vld [vmem:[%s2577_s2 + $0x138] sm:$0xff] }
   0x3   :  { %v1496_v6 = vld [vmem:[%s2577_s2 + $0x120] sm:$0xff]  ;;  %v1502_v7 = vld [vmem:[%s2577_s2 + $0x178] sm:$0xff]  ;;  %v1507_v8 = vld [vmem:[%s2577_s2 + $0x108] sm:$0xff] }
   0x4   :  { %88 = vmatpush.msra.mxu0 %v34_v2  ;;  %279 = vmatpush.msra.mxu3 %v1478_v3  ;;  %v1514_v9 = vld [vmem:[%s2577_s2 + $0x160] sm:$0xff]  ;;  %v1519_v10 = vld [vmem:[%s2577_s2 + $0xf0] sm:$0xff]  ;;  %v1525_v11 = vld [vmem:[%s2577_s2 + $0x148] sm:$0xff] }
   0x5   :  { %1246 = vmatmul.msk.f32.vlgmr.msra.gmra.mxu0 %vm48_vm0, %v1483_v4  ;;  %v1531_v12 = vld [vmem:[%s2578_s0 + $0x8] sm:$0xff]  ;;  %v1536_v13 = vld [vmem:[%s2577_s2 + $0xd8] sm:$0xff]  ;;  %v1542_v14 = vld [vmem:[%s2577_s2 + $0x130] sm:$0xff] }
   0x6   :  { %280 = vmatpush.msra.mxu3 %v1488_v5  ;;  %318 = vmatpush.msrb.mxu0 %v1502_v7  ;;  %v1550_v15 = vld [vmem:[%s2577_s2 + $0xc0] sm:$0xff]  ;;  %v1555_v16 = vld [vmem:[%s2577_s2 + $0x118] sm:$0xff]  ;;  %v1562_v17 = vld [vmem:[%s2577_s2 + $0xa8] sm:$0xff] }
   0x7   :  { %v1567_v18 = vld [vmem:[%s2577_s2 + $0x100] sm:$0xff]  ;;  %v1574_v19 = vld [vmem:[%s2577_s2 + $0x90] sm:$0xff]  ;;  %v1586_v21 = vld [vmem:[%s2577_s2 + $0xe8] sm:$0xff] }
   0x8   :  { %281 = vmatpush.msra.mxu3 %v1496_v6  ;;  %319 = vmatpush.msrb.mxu0 %v1514_v9  ;;  %v1580_v20 = vld [vmem:[%s2578_s0 + $0x10] sm:$0xff]  ;;  %v1591_v22 = vld [vmem:[%s2577_s2 + $0x78] sm:$0xff]  ;;  %v1605_v24 = vld [vmem:[%s2577_s2 + $0x60] sm:$0xff] }
   0x9   :  { %v1598_v23 = vld [vmem:[%s2577_s2 + $0xd0] sm:$0xff]  ;;  %v1612_v25 = vld [vmem:[%s2577_s2 + $0xb8] sm:$0xff]  ;;  %v1617_v26 = vld [vmem:[%s2577_s2 + $0x48] sm:$0xff] }
   0xa   :  { %282 = vmatpush.msra.mxu3 %v1507_v8  ;;  %320 = vmatpush.msrb.mxu0 %v1525_v11  ;;  %v1624_v27 = vld [vmem:[%s2577_s2 + $0xa0] sm:$0xff]  ;;  %v1629_v28 = vld [vmem:[%s2577_s2 + $0x30] sm:$0xff]  ;;  %v1635_v29 = vld [vmem:[%s2578_s0 + $0x18] sm:$0xff] }
   0xb   :  { %2604 = vst [vmem:[#allocation3_spill] sm:$0xff] %v1629_v28  ;;  %v1641_v30 = vld [vmem:[%s2577_s2 + $0x88] sm:$0xff]  ;;  %v1646_v31 = vld [vmem:[%s2577_s2 + $0x18] sm:$0xff]  ;;  %v1653_v32 = vld [vmem:[%s2577_s2 + $0x70] sm:$0xff] }
   0xc   :  { %283 = vmatpush.msra.mxu3 %v1519_v10  ;;  %321 = vmatpush.msrb.mxu0 %v1542_v14  ;;  %2605 = vst [vmem:[#allocation4_spill] sm:$0xff] %v1646_v31  ;;  %v1660_v33 = vld [vmem:[%s2577_s2] sm:$0xff]  ;;  %v39_v34 = vld [vmem:[%s2576_s1 + $0x28] sm:$0xff]  ;;  %v1670_v35 = vld [vmem:[%s2577_s2 + $0x58] sm:$0xff] }
   0xd   :  { %1247 = vmatmul.msk.f32.gmra.mxu0 %vm48_vm0, %v1531_v12  ;;  %2606 = vst [vmem:[#allocation5_spill] sm:$0xff] %v1660_v33  ;;  %v1675_v36 = vld [vmem:[%s2577_s2 + $0x170] sm:$0xff]  ;;  %169 = vmatpush.msra.mxu2 %v39_v34  ;;  %v1685_v38 = vld [vmem:[%s2577_s2 + $0x40] sm:$0xff]  ;;  %v1691_v40 = vld [vmem:[%s2577_s2 + $0x158] sm:$0xff] }
   0xe   :  { %284 = vmatpush.msra.mxu3 %v1536_v13  ;;  %322 = vmatpush.msrb.mxu0 %v1555_v16  ;;  %v36_v37 = vld [vmem:[%s2576_s1 + $0x10] sm:$0xff]  ;;  %2607 = vst [vmem:[#allocation6_spill] sm:$0xff] %v1685_v38  ;;  %v38_v41 = vld [vmem:[%s2576_s1 + $0x20] sm:$0xff]  ;;  %v1699_v42 = vld [vmem:[%s2577_s2 + $0x28] sm:$0xff] }
   0xf   :  { %170 = vmatpush.msra.mxu2 %v36_v37  ;;  %2608 = vst [vmem:[#allocation7_spill] sm:$0xff] %v1699_v42  ;;  %v1705_v43 = vld [vmem:[%s2578_s0 + $0x20] sm:$0xff]  ;;  %v35_v44 = vld [vmem:[%s2576_s1 + $0x8] sm:$0xff]  ;;  %128 = vmatpush.msra.mxu1 %v38_v41  ;;  %v1723_v46 = vld [vmem:[%s2577_s2 + $0x10] sm:$0xff] }
  0x10   :  { %285 = vmatpush.msra.mxu3 %v1550_v15  ;;  %323 = vmatpush.msrb.mxu0 %v1567_v18  ;;  %v1714_v45 = vld [vmem:[%s2577_s2 + $0x140] sm:$0xff]  ;;  %2609 = vst [vmem:[#allocation8_spill] sm:$0xff] %v1723_v46  ;;  %v1730_v47 = vld [vmem:[%s2577_s2 + $0x128] sm:$0xff]  ;;  %v1738_v48 = vld [vmem:[%s2577_s2 + $0x110] sm:$0xff] }
  0x11   :  { %1262 = vmatmul.msk.f32.vlgmr.msra.gmra.mxu2 %vm48_vm0, %v1483_v4  ;;  %129 = vmatpush.msra.mxu1 %v35_v44  ;;  %v1747_v49 = vld [vmem:[%s2577_s2 + $0xf8] sm:$0xff]  ;;  %v1755_v50 = vld [vmem:[%s2578_s0 + $0x28] sm:$0xff]  ;;  %v1761_v51 = vld [vmem:[%s2577_s2 + $0xe0] sm:$0xff] }
  0x12   :  { %286 = vmatpush.msra.mxu3 %v1562_v17  ;;  %324 = vmatpush.msrb.mxu0 %v1586_v21  ;;  %v1773_v52 = vld [vmem:[%s2577_s2 + $0xc8] sm:$0xff]  ;;  %v1782_v53 = vld [vmem:[%s2577_s2 + $0xb0] sm:$0xff]  ;;  %v1791_v54 = vld [vmem:[%s2577_s2 + $0x98] sm:$0xff] }
  0x13   :  { %1254 = vmatmul.msk.f32.vlgmr.msra.gmra.mxu1 %vm48_vm0, %v1483_v4  ;;  %412 = vmatpush.msrb.mxu2 %v1675_v36  ;;  %v1799_v55 = vld [vmem:[%s2578_s0 + $0x30] sm:$0xff]  ;;  %v1805_v56 = vld [vmem:[%s2577_s2 + $0x80] sm:$0xff]  ;;  %v1817_v57 = vld [vmem:[%s2577_s2 + $0x68] sm:$0xff] }
  0x14   :  { %287 = vmatpush.msra.mxu3 %v1574_v19  ;;  %325 = vmatpush.msrb.mxu0 %v1598_v23  ;;  %v1826_v58 = vld [vmem:[%s2577_s2 + $0x50] sm:$0xff]  ;;  %v1835_v59 = vld [vmem:[%s2577_s2 + $0x38] sm:$0xff]  ;;  %v1849_v61 = vld [vmem:[%s2577_s2 + $0x20] sm:$0xff] }
  0x15   :  { %1248 = vmatmul.msk.f32.gmra.mxu0 %vm48_vm0, %v1580_v20  ;;  %392 = vmatpush.msrb.mxu1 %v1469_v1  ;;  %2610 = vst [vmem:[#allocation9_spill] sm:$0xff] %v1826_v58  ;;  %v1843_v60 = vld [vmem:[%s2578_s0 + $0x38] sm:$0xff]  ;;  %v1861_v62 = vld [vmem:[%s2577_s2 + $0x8] sm:$0xff]  ;;  %v40_v0 = vld [vmem:[%s2580_s3] sm:$0x7] }
  0x16   :  { %288 = vmatpush.msra.mxu3 %v1591_v22  ;;  %326 = vmatpush.msrb.mxu0 %v1612_v25  ;;  %2611 = vst [vmem:[#allocation10_spill] sm:$0xff] %v1835_v59  ;;  %v42_v2 = vperm.slane %v40_v0, 0 }
  0x17   :  { %393 = vmatpush.msrb.mxu1 %v1478_v3  ;;  %413 = vmatpush.msrb.mxu2 %v1691_v40  ;;  %2612 = vst [vmem:[#allocation11_spill] sm:$0xff] %v1849_v61 }
  0x18   :  { %289 = vmatpush.msra.mxu3 %v1605_v24  ;;  %327 = vmatpush.msrb.mxu0 %v1624_v27  ;;  %2613 = vst [vmem:[#allocation12_spill] sm:$0xff] %v1861_v62 }
  0x19   :  { %1263 = vmatmul.msk.f32.gmra.mxu2 %vm48_vm0, %v1531_v12  ;;  %394 = vmatpush.msrb.mxu1 %v1488_v5 }
  0x1a   :  { %290 = vmatpush.msra.mxu3 %v1617_v26  ;;  %328 = vmatpush.msrb.mxu0 %v1641_v30 }
  0x1b   :  { %414 = vmatpush.msrb.mxu2 %v1714_v45  ;;  %395 = vmatpush.msrb.mxu1 %v1496_v6 }
  0x1c   :  { %291 = vmatpush.msra.mxu3 %v1629_v28  ;;  %329 = vmatpush.msrb.mxu0 %v1653_v32 }
  0x1d   :  { %1249 = vmatmul.msk.f32.gmra.mxu0 %vm48_vm0, %v1635_v29  ;;  %1255 = vmatmul.msk.f32.gmra.mxu1 %vm48_vm0, %v1531_v12 }
  0x1e   :  { %292 = vmatpush.msra.mxu3 %v1646_v31  ;;  %330 = vmatpush.msrb.mxu0 %v1670_v35 }
  0x1f   :  { %415 = vmatpush.msrb.mxu2 %v1730_v47  ;;  %396 = vmatpush.msrb.mxu1 %v1507_v8 }
  0x20   :  { %293 = vmatpush.msra.mxu3 %v1660_v33  ;;  %331 = vmatpush.msrb.mxu0 %v1685_v38 }
  0x21   :  { %294 = vmatmul.f32.vlgmr.msra.gmra.mxu3 %v1422_v39  ;;  %416 = vmatpush.msrb.mxu2 %v1738_v48 }
  0x22   :  { %298 = vmatpush.msrb.mxu3 %v1675_v36  ;;  %332 = vmatpush.msrb.mxu0 %v1699_v42 }
  0x23   :  { %397 = vmatpush.msrb.mxu1 %v1519_v10  ;;  %1264 = vmatmul.msk.f32.gmra.mxu2 %vm48_vm0, %v1580_v20 }
  0x24   :  { %299 = vmatpush.msrb.mxu3 %v1691_v40  ;;  %333 = vmatpush.msrb.mxu0 %v1723_v46 }
  0x25   :  { %1250 = vmatmul.msk.f32.gmra.mxu0 %vm48_vm0, %v1705_v43  ;;  %398 = vmatpush.msrb.mxu1 %v1536_v13 }
  0x26   :  { %300 = vmatpush.msrb.mxu3 %v1714_v45  ;;  %506 = vmatpush.msra.mxu0 %v1469_v1 }
  0x27   :  { %417 = vmatpush.msrb.mxu2 %v1747_v49  ;;  %399 = vmatpush.msrb.mxu1 %v1550_v15 }
  0x28   :  { %301 = vmatpush.msrb.mxu3 %v1730_v47  ;;  %507 = vmatpush.msra.mxu0 %v1478_v3 }
  0x29   :  { %1256 = vmatmul.msk.f32.gmra.mxu1 %vm48_vm0, %v1580_v20  ;;  %418 = vmatpush.msrb.mxu2 %v1761_v51 }
  0x2a   :  { %302 = vmatpush.msrb.mxu3 %v1738_v48  ;;  %508 = vmatpush.msra.mxu0 %v1488_v5 }
  0x2b   :  { %400 = vmatpush.msrb.mxu1 %v1562_v17  ;;  %419 = vmatpush.msrb.mxu2 %v1773_v52 }
  0x2c   :  { %303 = vmatpush.msrb.mxu3 %v1747_v49  ;;  %509 = vmatpush.msra.mxu0 %v1496_v6 }
  0x2d   :  { %1251 = vmatmul.msk.f32.gmra.mxu0 %vm48_vm0, %v1755_v50  ;;  %401 = vmatpush.msrb.mxu1 %v1574_v19 }
  0x2e   :  { %304 = vmatpush.msrb.mxu3 %v1761_v51  ;;  %510 = vmatpush.msra.mxu0 %v1507_v8 }
  0x2f   :  { %1265 = vmatmul.msk.f32.gmra.mxu2 %vm48_vm0, %v1635_v29  ;;  %402 = vmatpush.msrb.mxu1 %v1591_v22 }
  0x30   :  { %305 = vmatpush.msrb.mxu3 %v1773_v52  ;;  %420 = vmatpush.msrb.mxu2 %v1782_v53 }
  0x31   :  { %403 = vmatpush.msrb.mxu1 %v1605_v24  ;;  %511 = vmatpush.msra.mxu0 %v1519_v10 }
  0x32   :  { %306 = vmatpush.msrb.mxu3 %v1782_v53  ;;  %1257 = vmatmul.msk.f32.gmra.mxu1 %vm48_vm0, %v1635_v29 }
  0x33   :  { %421 = vmatpush.msrb.mxu2 %v1791_v54  ;;  %404 = vmatpush.msrb.mxu1 %v1617_v26 }
  0x34   :  { %307 = vmatpush.msrb.mxu3 %v1791_v54  ;;  %512 = vmatpush.msra.mxu0 %v1536_v13 }
  0x35   :  { %1252 = vmatmul.msk.f32.gmra.mxu0 %vm48_vm0, %v1799_v55  ;;  %422 = vmatpush.msrb.mxu2 %v1805_v56 }
  0x36   :  { %308 = vmatpush.msrb.mxu3 %v1805_v56  ;;  %405 = vmatpush.msrb.mxu1 %v1629_v28 }
  0x37   :  { %1266 = vmatmul.msk.f32.gmra.mxu2 %vm48_vm0, %v1705_v43  ;;  %513 = vmatpush.msra.mxu0 %v1550_v15 }
  0x38   :  { %309 = vmatpush.msrb.mxu3 %v1817_v57  ;;  %423 = vmatpush.msrb.mxu2 %v1817_v57 }
  0x39   :  { %406 = vmatpush.msrb.mxu1 %v1646_v31  ;;  %514 = vmatpush.msra.mxu0 %v1562_v17 }
  0x3a   :  { %310 = vmatpush.msrb.mxu3 %v1826_v58  ;;  %1258 = vmatmul.msk.f32.gmra.mxu1 %vm48_vm0, %v1705_v43 }
  0x3b   :  { %424 = vmatpush.msrb.mxu2 %v1826_v58  ;;  %407 = vmatpush.msrb.mxu1 %v1660_v33 }
  0x3c   :  { %311 = vmatpush.msrb.mxu3 %v1835_v59  ;;  %515 = vmatpush.msra.mxu0 %v1574_v19 }
  0x3d   :  { %1253 = vmatmul.msk.f32.gmra.mxu0 %vm48_vm0, %v1843_v60  ;;  %526 = vmatpush.msra.mxu1 %v1675_v36 }
  0x3e   :  { %312 = vmatpush.msrb.mxu3 %v1849_v61  ;;  %425 = vmatpush.msrb.mxu2 %v1835_v59 }
  0x3f   :  { %527 = vmatpush.msra.mxu1 %v1691_v40  ;;  %1267 = vmatmul.msk.f32.gmra.mxu2 %vm48_vm0, %v1755_v50 }
  0x40   :  { %313 = vmatpush.msrb.mxu3 %v1861_v62  ;;  %426 = vmatpush.msrb.mxu2 %v1849_v61 }
  0x41   :  { %314 = vmatmul.f32.vlgmr.msrb.gmra.mxu3 %v1422_v39  ;;  %528 = vmatpush.msra.mxu1 %v1714_v45 }
  0x42   :  { %432 = vmatpush.msra.mxu3 %v1502_v7  ;;  %1259 = vmatmul.msk.f32.gmra.mxu1 %vm48_vm0, %v1755_v50 }
  0x43   :  { %427 = vmatpush.msrb.mxu2 %v1861_v62  ;;  %529 = vmatpush.msra.mxu1 %v1730_v47 }
  0x44   :  { %433 = vmatpush.msra.mxu3 %v1514_v9  ;;  %516 = vmatpush.msra.mxu0 %v1591_v22 }
  0x45   :  { %334 = vmatmul.f32.vlgmr.msrb.gmra.mxu0 %v1422_v39  ;;  %546 = vmatpush.msra.mxu2 %v1502_v7 }
  0x46   :  { %434 = vmatpush.msra.mxu3 %v1525_v11  ;;  %530 = vmatpush.msra.mxu1 %v1738_v48 }
  0x47   :  { %547 = vmatpush.msra.mxu2 %v1514_v9  ;;  %517 = vmatpush.msra.mxu0 %v1605_v24 }
  0x48   :  { %435 = vmatpush.msra.mxu3 %v1542_v14  ;;  %1268 = vmatmul.msk.f32.gmra.mxu2 %vm48_vm0, %v1799_v55 }
  0x49   :  { %531 = vmatpush.msra.mxu1 %v1747_v49  ;;  %548 = vmatpush.msra.mxu2 %v1525_v11 }
  0x4a   :  { %436 = vmatpush.msra.mxu3 %v1555_v16  ;;  %1260 = vmatmul.msk.f32.gmra.mxu1 %vm48_vm0, %v1799_v55 }
  0x4b   :  { %532 = vmatpush.msra.mxu1 %v1761_v51  ;;  %549 = vmatpush.msra.mxu2 %v1542_v14 }
  0x4c   :  { %437 = vmatpush.msra.mxu3 %v1567_v18  ;;  %518 = vmatpush.msra.mxu0 %v1617_v26 }
  0x4d   :  { %533 = vmatpush.msra.mxu1 %v1773_v52  ;;  %550 = vmatpush.msra.mxu2 %v1555_v16 }
  0x4e   :  { %438 = vmatpush.msra.mxu3 %v1586_v21  ;;  %519 = vmatpush.msra.mxu0 %v1629_v28 }
  0x4f   :  { %534 = vmatpush.msra.mxu1 %v1782_v53  ;;  %551 = vmatpush.msra.mxu2 %v1567_v18 }
  0x50   :  { %439 = vmatpush.msra.mxu3 %v1598_v23  ;;  %1269 = vmatmul.msk.f32.gmra.mxu2 %vm48_vm0, %v1843_v60 }
  0x51   :  { %535 = vmatpush.msra.mxu1 %v1791_v54  ;;  %520 = vmatpush.msra.mxu0 %v1646_v31 }
  0x52   :  { %440 = vmatpush.msra.mxu3 %v1612_v25  ;;  %1261 = vmatmul.msk.f32.gmra.mxu1 %vm48_vm0, %v1843_v60 }
  0x53   :  { %536 = vmatpush.msra.mxu1 %v1805_v56  ;;  %552 = vmatpush.msra.mxu2 %v1586_v21 }
  0x54   :  { %441 = vmatpush.msra.mxu3 %v1624_v27  ;;  %521 = vmatpush.msra.mxu0 %v1660_v33 }
  0x55   :  { %537 = vmatpush.msra.mxu1 %v1817_v57  ;;  %553 = vmatpush.msra.mxu2 %v1598_v23 }
  0x56   :  { %442 = vmatpush.msra.mxu3 %v1641_v30  ;;  %640 = vmatpush.msrb.mxu0 %v1675_v36 }
  0x57   :  { %538 = vmatpush.msra.mxu1 %v1826_v58  ;;  %554 = vmatpush.msra.mxu2 %v1612_v25 }
  0x58   :  { %443 = vmatpush.msra.mxu3 %v1653_v32  ;;  %641 = vmatpush.msrb.mxu0 %v1691_v40 }
  0x59   :  { %539 = vmatpush.msra.mxu1 %v1835_v59  ;;  %555 = vmatpush.msra.mxu2 %v1624_v27 }
  0x5a   :  { %444 = vmatpush.msra.mxu3 %v1670_v35  ;;  %642 = vmatpush.msrb.mxu0 %v1714_v45 }
  0x5b   :  { %540 = vmatpush.msra.mxu1 %v1849_v61  ;;  %556 = vmatpush.msra.mxu2 %v1641_v30 }
  0x5c   :  { %445 = vmatpush.msra.mxu3 %v1685_v38  ;;  %643 = vmatpush.msrb.mxu0 %v1730_v47 }
  0x5d   :  { %541 = vmatpush.msra.mxu1 %v1861_v62  ;;  %557 = vmatpush.msra.mxu2 %v1653_v32 }
  0x5e   :  { %446 = vmatpush.msra.mxu3 %v1699_v42  ;;  %644 = vmatpush.msrb.mxu0 %v1738_v48 }
  0x5f   :  { %558 = vmatpush.msra.mxu2 %v1670_v35 }
  0x60   :  { %447 = vmatpush.msra.mxu3 %v1723_v46  ;;  %645 = vmatpush.msrb.mxu0 %v1747_v49 }
  0x61   :  { %559 = vmatpush.msra.mxu2 %v1685_v38 }
  0x62   :  { %620 = vmatpush.msrb.mxu3 %v1469_v1  ;;  %646 = vmatpush.msrb.mxu0 %v1761_v51 }
  0x63   :  { %560 = vmatpush.msra.mxu2 %v1699_v42 }
  0x64   :  { %621 = vmatpush.msrb.mxu3 %v1478_v3  ;;  %647 = vmatpush.msrb.mxu0 %v1773_v52 }
  0x65   :  { %561 = vmatpush.msra.mxu2 %v1723_v46 }
  0x66   :  { %622 = vmatpush.msrb.mxu3 %v1488_v5  ;;  %648 = vmatpush.msrb.mxu0 %v1782_v53 }
  0x68   :  { %623 = vmatpush.msrb.mxu3 %v1496_v6  ;;  %649 = vmatpush.msrb.mxu0 %v1791_v54 }
  0x6a   :  { %624 = vmatpush.msrb.mxu3 %v1507_v8  ;;  %650 = vmatpush.msrb.mxu0 %v1805_v56 }
  0x6c   :  { %625 = vmatpush.msrb.mxu3 %v1519_v10  ;;  %651 = vmatpush.msrb.mxu0 %v1817_v57 }
  0x6e   :  { %626 = vmatpush.msrb.mxu3 %v1536_v13  ;;  %652 = vmatpush.msrb.mxu0 %v1826_v58 }
  0x70   :  { %627 = vmatpush.msrb.mxu3 %v1550_v15  ;;  %653 = vmatpush.msrb.mxu0 %v1835_v59 }
  0x72   :  { %628 = vmatpush.msrb.mxu3 %v1562_v17  ;;  %654 = vmatpush.msrb.mxu0 %v1849_v61 }
  0x74   :  { %629 = vmatpush.msrb.mxu3 %v1574_v19  ;;  %655 = vmatpush.msrb.mxu0 %v1861_v62 }
  0x76   :  { %630 = vmatpush.msrb.mxu3 %v1591_v22 }
  0x78   :  { %631 = vmatpush.msrb.mxu3 %v1605_v24 }
  0x7a   :  { %632 = vmatpush.msrb.mxu3 %v1617_v26 }
  0x7c   :  { %633 = vmatpush.msrb.mxu3 %v1629_v28 }
  0x7e   :  { %634 = vmatpush.msrb.mxu3 %v1646_v31 }
  0x80   :  { %635 = vmatpush.msrb.mxu3 %v1660_v33 }
  0x82   :  { %v90_v63 = vpop.f32.mrf.mxu0 }
  0x83   :  { %v91_v41 = vadd.f32 %v90_v63, %v42_v2 }
  0x8a   :  { %v93_v4 = vpop.f32.mrf.mxu0 }
  0x8b   :  { %v1991_v12 = vadd.f32 %v93_v4, %v42_v2 }
  0x8d   :  { %2614 = vst [vmem:[#allocation13_spill] sm:$0xff] %v1991_v12 }
  0x90   :  { %v131_v63 = vpop.f32.mrf.mxu1 }
  0x92   :  { %v96_v20 = vpop.f32.mrf.mxu0 }
  0x93   :  { %v1993_v29 = vadd.f32 %v96_v20, %v42_v2 }
  0x95   :  { %2615 = vst [vmem:[#allocation14_spill] sm:$0xff] %v1993_v29 }
  0x9a   :  { %v99_v34 = vpop.f32.mrf.mxu0 }
  0x9b   :  { %v1995_v37 = vadd.f32 %v99_v34, %v42_v2 }
  0x9d   :  { %2616 = vst [vmem:[#allocation15_spill] sm:$0xff] %v1995_v37  ;;  %v2005_v37 = vperm.slane %v40_v0, 1 }
  0x9f   :  { %2621 = vst [vmem:[#allocation20_spill] sm:$0xff] %v2005_v37 }
  0xa2   :  { %v102_v39 = vpop.f32.mrf.mxu0 }
  0xa3   :  { %v1997_v43 = vadd.f32 %v102_v39, %v42_v2 }
  0xa4   :  { %v295_v44 = vpop.f32.mrf.mxu3 }
  0xa5   :  { %2617 = vst [vmem:[#allocation16_spill] sm:$0xff] %v1997_v43  ;;  %v338_v50 = vadd.f32 %v295_v44, %v91_v41  ;;  %v132_v41 = vadd.f32 %v131_v63, %v2005_v37 }
  0xa7   :  { %v1270_v55 = vmul.f32 -1.442695, %v338_v50 }
  0xa9   :  { %1289 = vpow2.f32 %v1270_v55 }
  0xaa   :  { %v105_v60 = vpop.f32.mrf.mxu0 }
  0xab   :  { %v1999_v62 = vadd.f32 %v105_v60, %v42_v2 }
  0xad   :  { %2618 = vst [vmem:[#allocation17_spill] sm:$0xff] %v1999_v62 }
  0xaf   :  { %v1290_v33 = vpop.eup %1289 }
  0xb0   :  { %v346_v20 = vadd.f32 1.0, %v1290_v33  ;;  %v2011_v33 = vld [vmem:[%s2579_s4] ss:$0 sm:$0xff] }
  0xb2   :  { %v108_v4 = vpop.f32.mrf.mxu0  ;;  %1291 = vrcp.f32 %v346_v20  ;;  %vm353_vm2 = vweird.f32 %v346_v20 }
  0xb3   :  { %v2001_v12 = vadd.f32 %v108_v4, %v42_v2 }
  0xb5   :  { %2619 = vst [vmem:[#allocation18_spill] sm:$0xff] %v2001_v12  ;;  %v357_v12 = vand.u32 2147483647, %v346_v20 }
  0xb7   :  { %vm358_vm4 = vcmp.eq.f32.partialorder %v357_v12, 8.507059e+37 }
  0xb8   :  { %v1292_v39 = vpop.eup %1291 }
  0xb9   :  { %v349_v44 = vmul.f32 %v1292_v39, %v346_v20  ;;  %vm354_vm1 = vweird.f32 %v1292_v39 }
  0xba   :  { %v111_v29 = vpop.f32.mrf.mxu0  ;;  %vm355_vm3 = vmor %vm353_vm2, %vm354_vm1 }
  0xbb   :  { %v2003_v34 = vadd.f32 %v111_v29, %v42_v2  ;;  %v350_v62 = vsub.f32 1.0, %v349_v44  ;;  %v2014_v44 = vperm.slane %v40_v0, 2 }
  0xbd   :  { %2620 = vst [vmem:[#allocation19_spill] sm:$0xff] %v2003_v34  ;;  %v351_v43 = vmul.f32 %v1292_v39, %v350_v62  ;;  %v359_v34 = vand.u32 2147483648, %v346_v20 }
  0xbf   :  { %v352_v2 = vadd.f32 %v1292_v39, %v351_v43  ;;  %v360_v62 = vor.u32 1.1754944e-38, %v359_v34 }
  0xc1   :  { %v356_v37 = vsel %vm355_vm3, %v1292_v39, %v352_v2 }
  0xc2   :  { %v335_v4 = vpop.f32.mrf.mxu0 }
  0xc4   :  { %v315_v50 = vpop.f32.mrf.mxu3 }
  0xc5   :  { %v339_v60 = vadd.f32 %v315_v50, %v132_v41  ;;  %v378_v41 = vadd.f32 %v2011_v33, %v335_v4  ;;  %v172_v50 = vpop.f32.mrf.mxu2 }
  0xc6   :  { %v173_v43 = vadd.f32 %v172_v50, %v2014_v44 }
  0xc7   :  { %v1271_v55 = vmul.f32 -1.442695, %v339_v60  ;;  %v361_v60 = vsel %vm358_vm4, %v360_v62, %v356_v37 }
  0xc9   :  { %1293 = vpow2.f32 %v1271_v55  ;;  %v379_v55 = vmul.f32 %v378_v41, %v361_v60  ;;  %v2627_v60 = vld [vmem:[#allocation12_spill] sm:$0xff] }
  0xcb   :  { %v380_v31 = vadd.f32 %v379_v55, %v173_v43  ;;  %v134_v55 = vpop.f32.mrf.mxu1 }
  0xcd   :  { %v175_v43 = vpop.f32.mrf.mxu2 }
  0xcf   :  { %v1294_v29 = vpop.eup %1293 }
  0xd0   :  { %v347_v63 = vadd.f32 1.0, %v1294_v29 }
  0xd2   :  { %1295 = vrcp.f32 %v347_v63  ;;  %v374_v20 = vand.u32 2147483648, %v347_v63  ;;  %v372_v39 = vand.u32 2147483647, %v347_v63  ;;  %vm368_vm6 = vweird.f32 %v347_v63 }
  0xd3   :  { %1297 = vtanh.f32 %v380_v31  ;;  %v2622_v31 = vld [vmem:[#allocation7_spill] sm:$0xff] }
  0xd4   :  { %v375_v0 = vor.u32 1.1754944e-38, %v374_v20  ;;  %vm373_vm8 = vcmp.eq.f32.partialorder %v372_v39, 8.507059e+37  ;;  %v2070_v20 = vpop.f32.mrf.mxu1 }
  0xd5   :  { %2628 = vst [vmem:[#allocation21_spill] sm:$0xff] %v2070_v20 }
  0xd8   :  { %v1296_v46 = vpop.eup %1295 }
  0xd9   :  { %v364_v61 = vmul.f32 %v1296_v46, %v347_v63  ;;  %vm369_vm5 = vweird.f32 %v1296_v46  ;;  %v1298_v4 = vpop.eup %1297  ;;  %v2626_v63 = vld [vmem:[#allocation5_spill] sm:$0xff] }
  0xda   :  { %vm370_vm7 = vmor %vm368_vm6, %vm369_vm5 }
  0xdb   :  { %v365_v42 = vsub.f32 1.0, %v364_v61  ;;  %v2625_v61 = vld [vmem:[#allocation8_spill] sm:$0xff] }
  0xdc   :  { %v2074_v39 = vpop.f32.mrf.mxu1 }
  0xdd   :  { %v366_v29 = vmul.f32 %v1296_v46, %v365_v42  ;;  %v2623_v42 = vld [vmem:[#allocation4_spill] sm:$0xff]  ;;  %2630 = vst [vmem:[#allocation23_spill] sm:$0xff] %v2074_v39  ;;  %v2640_v39 = vld [vmem:[#allocation13_spill] sm:$0xff] }
  0xdf   :  { %v367_v2 = vadd.f32 %v1296_v46, %v366_v29  ;;  %v2072_v29 = vpop.f32.mrf.mxu2 }
  0xe0   :  { %2629 = vst [vmem:[#allocation22_spill] sm:$0xff] %v2072_v29 }
  0xe1   :  { %v371_v34 = vsel %vm370_vm7, %v1296_v46, %v367_v2  ;;  %v2624_v46 = vld [vmem:[#allocation11_spill] sm:$0xff] }
  0xe2   :  { %v376_v12 = vsel %vm373_vm8, %v375_v0, %v371_v34 }
  0xe3   :  { %v382_v37 = vsub.f32 1.0, %v376_v12  ;;  %v384_v62 = vmul.f32 0.0, %v376_v12 }
  0xe4   :  { %v2078_v0 = vpop.f32.mrf.mxu1 }
  0xe5   :  { %v383_v41 = vmul.f32 %v1298_v4, %v382_v37  ;;  %2632 = vst [vmem:[#allocation25_spill] sm:$0xff] %v2078_v0 }
  0xe7   :  { %v2017_v50 = vadd.f32 %v384_v62, %v383_v41  ;;  %v2076_v2 = vpop.f32.mrf.mxu2 }
  0xe8   :  { %2631 = vst [vmem:[#allocation24_spill] sm:$0xff] %v2076_v2 }
  0xe9   :  { %408 = vmatmul.f32.vlgmr.msrb.gmra.mxu1 %v2017_v50  ;;  %428 = vmatmul.f32.vlgmr.msrb.gmra.mxu2 %v2017_v50 }
  0xea   :  { %448 = vmatmul.f32.vlgmr.msra.gmra.mxu3 %v2017_v50  ;;  %660 = vmatpush.msrb.mxu1 %v1502_v7 }
  0xeb   :  { %734 = vmatpush.msrb.mxu2 %v1469_v1  ;;  %754 = vmatpush.msra.mxu3 %v1675_v36 }
  0xec   :  { %661 = vmatpush.msrb.mxu1 %v1514_v9  ;;  %v2082_v12 = vpop.f32.mrf.mxu1 }
  0xed   :  { %735 = vmatpush.msrb.mxu2 %v1478_v3  ;;  %755 = vmatpush.msra.mxu3 %v1691_v40  ;;  %2634 = vst [vmem:[#allocation27_spill] sm:$0xff] %v2082_v12 }
  0xee   :  { %662 = vmatpush.msrb.mxu1 %v1525_v11 }
  0xef   :  { %736 = vmatpush.msrb.mxu2 %v1488_v5  ;;  %756 = vmatpush.msra.mxu3 %v1714_v45  ;;  %v2080_v34 = vpop.f32.mrf.mxu2 }
  0xf0   :  { %663 = vmatpush.msrb.mxu1 %v1542_v14  ;;  %2633 = vst [vmem:[#allocation26_spill] sm:$0xff] %v2080_v34 }
  0xf1   :  { %737 = vmatpush.msrb.mxu2 %v1496_v6  ;;  %757 = vmatpush.msra.mxu3 %v1730_v47 }
  0xf2   :  { %664 = vmatpush.msrb.mxu1 %v1555_v16 }
  0xf3   :  { %738 = vmatpush.msrb.mxu2 %v1507_v8  ;;  %758 = vmatpush.msra.mxu3 %v1738_v48 }
  0xf4   :  { %665 = vmatpush.msrb.mxu1 %v1567_v18  ;;  %v2086_v4 = vpop.f32.mrf.mxu1 }
  0xf5   :  { %739 = vmatpush.msrb.mxu2 %v1519_v10  ;;  %759 = vmatpush.msra.mxu3 %v1747_v49  ;;  %2636 = vst [vmem:[#allocation29_spill] sm:$0xff] %v2086_v4 }
  0xf6   :  { %666 = vmatpush.msrb.mxu1 %v1586_v21 }
  0xf7   :  { %740 = vmatpush.msrb.mxu2 %v1536_v13  ;;  %760 = vmatpush.msra.mxu3 %v1761_v51  ;;  %v2084_v37 = vpop.f32.mrf.mxu2 }
  0xf8   :  { %667 = vmatpush.msrb.mxu1 %v1598_v23  ;;  %2635 = vst [vmem:[#allocation28_spill] sm:$0xff] %v2084_v37 }
  0xf9   :  { %741 = vmatpush.msrb.mxu2 %v1550_v15  ;;  %761 = vmatpush.msra.mxu3 %v1773_v52 }
  0xfa   :  { %668 = vmatpush.msrb.mxu1 %v1612_v25 }
  0xfb   :  { %742 = vmatpush.msrb.mxu2 %v1562_v17  ;;  %762 = vmatpush.msra.mxu3 %v1782_v53 }
  0xfc   :  { %669 = vmatpush.msrb.mxu1 %v1624_v27  ;;  %v2090_v62 = vpop.f32.mrf.mxu1 }
  0xfd   :  { %743 = vmatpush.msrb.mxu2 %v1574_v19  ;;  %763 = vmatpush.msra.mxu3 %v1791_v54  ;;  %2638 = vst [vmem:[#allocation31_spill] sm:$0xff] %v2090_v62 }
  0xfe   :  { %670 = vmatpush.msrb.mxu1 %v1641_v30 }
  0xff   :  { %744 = vmatpush.msrb.mxu2 %v1591_v22  ;;  %764 = vmatpush.msra.mxu3 %v1805_v56  ;;  %v2088_v41 = vpop.f32.mrf.mxu2 }
 0x100   :  { %671 = vmatpush.msrb.mxu1 %v1653_v32  ;;  %2637 = vst [vmem:[#allocation30_spill] sm:$0xff] %v2088_v41 }
 0x101   :  { %745 = vmatpush.msrb.mxu2 %v1605_v24  ;;  %765 = vmatpush.msra.mxu3 %v1817_v57 }
 0x102   :  { %672 = vmatpush.msrb.mxu1 %v1670_v35 }
 0x103   :  { %746 = vmatpush.msrb.mxu2 %v1617_v26  ;;  %766 = vmatpush.msra.mxu3 %v1826_v58 }
 0x104   :  { %673 = vmatpush.msrb.mxu1 %v1685_v38 }
 0x105   :  { %747 = vmatpush.msrb.mxu2 %v1629_v28  ;;  %767 = vmatpush.msra.mxu3 %v1835_v59 }
 0x106   :  { %674 = vmatpush.msrb.mxu1 %v2622_v31 }
 0x107   :  { %748 = vmatpush.msrb.mxu2 %v2623_v42  ;;  %768 = vmatpush.msra.mxu3 %v2624_v46  ;;  %v2092_v20 = vpop.f32.mrf.mxu2 }
 0x108   :  { %675 = vmatpush.msrb.mxu1 %v2625_v61  ;;  %2639 = vst [vmem:[#allocation32_spill] sm:$0xff] %v2092_v20 }
 0x109   :  { %749 = vmatpush.msrb.mxu2 %v2626_v63  ;;  %769 = vmatpush.msra.mxu3 %v2627_v60  ;;  %v2641_v63 = vld [vmem:[#allocation20_spill] sm:$0xff] }
 0x10a   :  { %v135_v0 = vadd.f32 %v134_v55, %v2641_v63 }
 0x166   :  { %v409_v29 = vpop.f32.mrf.mxu1 }
 0x167   :  { %v452_v60 = vadd.f32 %v409_v29, %v2640_v39 }
 0x169   :  { %v1272_v2 = vmul.f32 -1.442695, %v452_v60 }
 0x16b   :  { %1299 = vpow2.f32 %v1272_v2 }
 0x16c   :  { %v429_v34 = vpop.f32.mrf.mxu2 }
 0x16d   :  { %v453_v61 = vadd.f32 %v429_v34, %v135_v0  ;;  %v449_v55 = vpop.f32.mrf.mxu3 }
 0x16e   :  { %v492_v34 = vadd.f32 %v2011_v33, %v449_v55 }
 0x16f   :  { %v1273_v12 = vmul.f32 -1.442695, %v453_v61 }
 0x171   :  { %v1300_v46 = vpop.eup %1299  ;;  %1301 = vpow2.f32 %v1273_v12  ;;  %v176_v12 = vadd.f32 %v175_v43, %v2014_v44 }
 0x172   :  { %v460_v37 = vadd.f32 1.0, %v1300_v46 }
 0x174   :  { %1303 = vrcp.f32 %v460_v37  ;;  %v473_v31 = vand.u32 2147483648, %v460_v37  ;;  %v471_v60 = vand.u32 2147483647, %v460_v37  ;;  %vm467_vm10 = vweird.f32 %v460_v37 }
 0x176   :  { %v474_v61 = vor.u32 1.1754944e-38, %v473_v31  ;;  %vm472_vm12 = vcmp.eq.f32.partialorder %v471_v60, 8.507059e+37 }
 0x177   :  { %v1302_v4 = vpop.eup %1301 }
 0x178   :  { %v461_v41 = vadd.f32 1.0, %v1302_v4 }
 0x17a   :  { %v1304_v42 = vpop.eup %1303  ;;  %1305 = vrcp.f32 %v461_v41  ;;  %v486_v28 = vand.u32 2147483647, %v461_v41  ;;  %vm482_vm14 = vweird.f32 %v461_v41 }
 0x17b   :  { %v463_v62 = vmul.f32 %v1304_v42, %v460_v37  ;;  %vm468_vm9 = vweird.f32 %v1304_v42 }
 0x17c   :  { %vm469_vm11 = vmor %vm467_vm10, %vm468_vm9  ;;  %vm487_vm0 = vcmp.eq.f32.partialorder %v486_v28, 8.507059e+37 }
 0x17d   :  { %v464_v20 = vsub.f32 1.0, %v463_v62 }
 0x17f   :  { %v465_v59 = vmul.f32 %v1304_v42, %v464_v20  ;;  %v488_v20 = vand.u32 2147483648, %v461_v41 }
 0x180   :  { %v1306_v29 = vpop.eup %1305 }
 0x181   :  { %v478_v39 = vmul.f32 %v1306_v29, %v461_v41  ;;  %v466_v2 = vadd.f32 %v1304_v42, %v465_v59  ;;  %vm483_vm13 = vweird.f32 %v1306_v29  ;;  %v489_v31 = vor.u32 1.1754944e-38, %v488_v20  ;;  %v2655_v20 = vld [vmem:[#allocation22_spill] sm:$0xff] }
 0x182   :  { %vm484_vm15 = vmor %vm482_vm14, %vm483_vm13 }
 0x183   :  { %v479_v0 = vsub.f32 1.0, %v478_v39  ;;  %v470_v46 = vsel %vm469_vm11, %v1304_v42, %v466_v2 }
 0x184   :  { %v475_v4 = vsel %vm472_vm12, %v474_v61, %v470_v46 }
 0x185   :  { %v480_v62 = vmul.f32 %v1306_v29, %v479_v0  ;;  %v493_v63 = vmul.f32 %v492_v34, %v475_v4 }
 0x187   :  { %v494_v38 = vadd.f32 %v493_v63, %v176_v12  ;;  %v481_v58 = vadd.f32 %v1306_v29, %v480_v62 }
 0x189   :  { %1307 = vtanh.f32 %v494_v38  ;;  %v485_v59 = vsel %vm484_vm15, %v1306_v29, %v481_v58 }
 0x18a   :  { %v490_v42 = vsel %vm487_vm0, %v489_v31, %v485_v59  ;;  %v179_v59 = vadd.f32 %v2655_v20, %v2014_v44 }
 0x18b   :  { %v496_v37 = vsub.f32 1.0, %v490_v42  ;;  %v498_v43 = vmul.f32 %v490_v42, %v2017_v50 }
 0x18f   :  { %v1308_v60 = vpop.eup %1307 }
 0x190   :  { %v497_v55 = vmul.f32 %v1308_v60, %v496_v37 }
 0x192   :  { %v2099_v39 = vadd.f32 %v498_v43, %v497_v55 }
 0x194   :  { %522 = vmatmul.f32.vlgmr.msra.gmra.mxu0 %v2099_v39  ;;  %542 = vmatmul.f32.vlgmr.msra.gmra.mxu1 %v2099_v39 }
 0x195   :  { %562 = vmatmul.f32.vlgmr.msra.gmra.mxu2 %v2099_v39  ;;  %774 = vmatpush.msra.mxu0 %v1502_v7  ;;  %v2646_v7 = vld [vmem:[#allocation7_spill] sm:$0xff] }
 0x196   :  { %848 = vmatpush.msra.mxu1 %v1469_v1  ;;  %868 = vmatpush.msra.mxu2 %v1675_v36  ;;  %v2642_v1 = vld [vmem:[#allocation9_spill] sm:$0xff] }
 0x197   :  { %775 = vmatpush.msra.mxu0 %v1514_v9  ;;  %v2648_v9 = vld [vmem:[#allocation11_spill] sm:$0xff] }
 0x198   :  { %849 = vmatpush.msra.mxu1 %v1478_v3  ;;  %869 = vmatpush.msra.mxu2 %v1691_v40  ;;  %v2643_v3 = vld [vmem:[#allocation6_spill] sm:$0xff] }
 0x199   :  { %776 = vmatpush.msra.mxu0 %v1525_v11  ;;  %v2650_v11 = vld [vmem:[#allocation5_spill] sm:$0xff] }
 0x19a   :  { %850 = vmatpush.msra.mxu1 %v1488_v5  ;;  %870 = vmatpush.msra.mxu2 %v1714_v45  ;;  %v2644_v5 = vld [vmem:[#allocation3_spill] sm:$0xff] }
 0x19b   :  { %777 = vmatpush.msra.mxu0 %v1542_v14  ;;  %v2652_v14 = vld [vmem:[#allocation20_spill] sm:$0xff] }
 0x19c   :  { %851 = vmatpush.msra.mxu1 %v1496_v6  ;;  %871 = vmatpush.msra.mxu2 %v1730_v47  ;;  %v2645_v6 = vld [vmem:[#allocation10_spill] sm:$0xff] }
 0x19d   :  { %778 = vmatpush.msra.mxu0 %v1555_v16 }
 0x19e   :  { %852 = vmatpush.msra.mxu1 %v1507_v8  ;;  %872 = vmatpush.msra.mxu2 %v1738_v48  ;;  %v2647_v8 = vld [vmem:[#allocation4_spill] sm:$0xff] }
 0x19f   :  { %779 = vmatpush.msra.mxu0 %v1567_v18 }
 0x1a0   :  { %853 = vmatpush.msra.mxu1 %v1519_v10  ;;  %873 = vmatpush.msra.mxu2 %v1747_v49  ;;  %v2649_v10 = vld [vmem:[#allocation8_spill] sm:$0xff] }
 0x1a1   :  { %780 = vmatpush.msra.mxu0 %v1586_v21 }
 0x1a2   :  { %854 = vmatpush.msra.mxu1 %v1536_v13  ;;  %874 = vmatpush.msra.mxu2 %v1761_v51  ;;  %v2651_v13 = vld [vmem:[#allocation12_spill] sm:$0xff] }
 0x1a3   :  { %781 = vmatpush.msra.mxu0 %v1598_v23 }
 0x1a4   :  { %855 = vmatpush.msra.mxu1 %v1550_v15  ;;  %875 = vmatpush.msra.mxu2 %v1773_v52  ;;  %v2653_v15 = vld [vmem:[#allocation21_spill] sm:$0xff] }
 0x1a5   :  { %782 = vmatpush.msra.mxu0 %v1612_v25  ;;  %v138_v16 = vadd.f32 %v2653_v15, %v2652_v14  ;;  %v2167_v15 = vld [vmem:[%s2577_s2 + $0x178] sm:$0xff] }
 0x1a6   :  { %856 = vmatpush.msra.mxu1 %v1562_v17  ;;  %876 = vmatpush.msra.mxu2 %v1782_v53 }
 0x1a7   :  { %783 = vmatpush.msra.mxu0 %v1624_v27 }
 0x1a8   :  { %857 = vmatpush.msra.mxu1 %v1574_v19  ;;  %877 = vmatpush.msra.mxu2 %v1791_v54  ;;  %v2654_v19 = vld [vmem:[#allocation14_spill] sm:$0xff] }
 0x1a9   :  { %784 = vmatpush.msra.mxu0 %v1641_v30 }
 0x1aa   :  { %858 = vmatpush.msra.mxu1 %v1591_v22  ;;  %878 = vmatpush.msra.mxu2 %v1805_v56 }
 0x1ab   :  { %785 = vmatpush.msra.mxu0 %v1653_v32 }
 0x1ac   :  { %859 = vmatpush.msra.mxu1 %v1605_v24  ;;  %879 = vmatpush.msra.mxu2 %v1817_v57 }
 0x1ad   :  { %786 = vmatpush.msra.mxu0 %v1670_v35 }
 0x1ae   :  { %860 = vmatpush.msra.mxu1 %v1617_v26  ;;  %880 = vmatpush.msra.mxu2 %v2642_v1 }
 0x1af   :  { %787 = vmatpush.msra.mxu0 %v2643_v3 }
 0x1b0   :  { %861 = vmatpush.msra.mxu1 %v2644_v5  ;;  %881 = vmatpush.msra.mxu2 %v2645_v6 }
 0x1b1   :  { %788 = vmatpush.msra.mxu0 %v2646_v7 }
 0x1b2   :  { %862 = vmatpush.msra.mxu1 %v2647_v8  ;;  %882 = vmatpush.msra.mxu2 %v2648_v9 }
 0x1b3   :  { %789 = vmatpush.msra.mxu0 %v2649_v10 }
 0x1b4   :  { %863 = vmatpush.msra.mxu1 %v2650_v11  ;;  %883 = vmatpush.msra.mxu2 %v2651_v13 }
 0x211   :  { %v523_v17 = vpop.f32.mrf.mxu0  ;;  %v543_v18 = vpop.f32.mrf.mxu1 }
 0x212   :  { %v566_v21 = vadd.f32 %v523_v17, %v2654_v19  ;;  %v567_v22 = vadd.f32 %v543_v18, %v138_v16  ;;  %v2173_v16 = vld [vmem:[%s2577_s2 + $0x168] sm:$0xff]  ;;  %v2186_v17 = vld [vmem:[%s2577_s2 + $0x150] sm:$0xff]  ;;  %v2199_v18 = vld [vmem:[%s2577_s2 + $0x138] sm:$0xff] }
 0x213   :  { %v2212_v19 = vld [vmem:[%s2577_s2 + $0x120] sm:$0xff] }
 0x214   :  { %v1274_v23 = vmul.f32 -1.442695, %v566_v21  ;;  %v1275_v24 = vmul.f32 -1.442695, %v567_v22  ;;  %v2225_v21 = vld [vmem:[%s2577_s2 + $0x108] sm:$0xff]  ;;  %v2238_v22 = vld [vmem:[%s2577_s2 + $0xf0] sm:$0xff] }
 0x216   :  { %1309 = vpow2.f32 %v1274_v23  ;;  %v2251_v23 = vld [vmem:[%s2577_s2 + $0xd8] sm:$0xff] }
 0x217   :  { %1311 = vpow2.f32 %v1275_v24  ;;  %v2264_v24 = vld [vmem:[%s2577_s2 + $0xc0] sm:$0xff] }
 0x218   :  { %v563_v61 = vpop.f32.mrf.mxu2 }
 0x219   :  { %v606_v12 = vadd.f32 %v2011_v33, %v563_v61 }
 0x21c   :  { %v1310_v25 = vpop.eup %1309 }
 0x21d   :  { %v1312_v26 = vpop.eup %1311  ;;  %v574_v27 = vadd.f32 1.0, %v1310_v25  ;;  %v2277_v25 = vld [vmem:[%s2577_s2 + $0xa8] sm:$0xff] }
 0x21e   :  { %v575_v28 = vadd.f32 1.0, %v1312_v26  ;;  %v2290_v26 = vld [vmem:[%s2577_s2 + $0x90] sm:$0xff] }
 0x21f   :  { %1313 = vrcp.f32 %v574_v27  ;;  %v587_v63 = vand.u32 2147483648, %v574_v27  ;;  %v585_v29 = vand.u32 2147483647, %v574_v27  ;;  %vm581_vm2 = vweird.f32 %v574_v27 }
 0x220   :  { %1315 = vrcp.f32 %v575_v28  ;;  %v602_v42 = vand.u32 2147483648, %v575_v28  ;;  %vm596_vm6 = vweird.f32 %v575_v28  ;;  %v600_v37 = vand.u32 2147483647, %v575_v28 }
 0x221   :  { %v588_v46 = vor.u32 1.1754944e-38, %v587_v63  ;;  %vm586_vm4 = vcmp.eq.f32.partialorder %v585_v29, 8.507059e+37 }
 0x222   :  { %v603_v43 = vor.u32 1.1754944e-38, %v602_v42  ;;  %vm601_vm8 = vcmp.eq.f32.partialorder %v600_v37, 8.507059e+37 }
 0x225   :  { %v1314_v30 = vpop.eup %1313 }
 0x226   :  { %v1316_v32 = vpop.eup %1315  ;;  %v577_v35 = vmul.f32 %v1314_v30, %v574_v27  ;;  %vm582_vm1 = vweird.f32 %v1314_v30  ;;  %v2303_v27 = vld [vmem:[%s2577_s2 + $0x78] sm:$0xff] }
 0x227   :  { %v592_v38 = vmul.f32 %v1316_v32, %v575_v28  ;;  %vm583_vm3 = vmor %vm581_vm2, %vm582_vm1  ;;  %vm597_vm5 = vweird.f32 %v1316_v32  ;;  %v2316_v28 = vld [vmem:[%s2577_s2 + $0x60] sm:$0xff] }
 0x228   :  { %v578_v58 = vsub.f32 1.0, %v577_v35  ;;  %vm598_vm7 = vmor %vm596_vm6, %vm597_vm5  ;;  %v2355_v35 = vld [vmem:[%s2577_s2 + $0x18] sm:$0xff] }
 0x229   :  { %v593_v50 = vsub.f32 1.0, %v592_v38  ;;  %v2368_v38 = vld [vmem:[%s2577_s2] sm:$0xff] }
 0x22a   :  { %v579_v41 = vmul.f32 %v1314_v30, %v578_v58  ;;  %v2656_v58 = vld [vmem:[#allocation23_spill] sm:$0xff] }
 0x22b   :  { %v594_v2 = vmul.f32 %v1316_v32, %v593_v50  ;;  %v141_v50 = vadd.f32 %v2656_v58, %v2652_v14 }
 0x22c   :  { %v580_v0 = vadd.f32 %v1314_v30, %v579_v41 }
 0x22d   :  { %v595_v62 = vadd.f32 %v1316_v32, %v594_v2  ;;  %v2657_v2 = vld [vmem:[#allocation15_spill] sm:$0xff] }
 0x22e   :  { %v584_v34 = vsel %vm583_vm3, %v1314_v30, %v580_v0  ;;  %v2329_v30 = vld [vmem:[%s2577_s2 + $0x48] sm:$0xff] }
 0x22f   :  { %v589_v4 = vsel %vm586_vm4, %v588_v46, %v584_v34  ;;  %v599_v55 = vsel %vm598_vm7, %v1316_v32, %v595_v62  ;;  %v2342_v32 = vld [vmem:[%s2577_s2 + $0x30] sm:$0xff] }
 0x230   :  { %v607_v31 = vmul.f32 %v606_v12, %v589_v4  ;;  %v604_v3 = vsel %vm601_vm8, %v603_v43, %v599_v55 }
 0x231   :  { %v610_v5 = vsub.f32 1.0, %v604_v3  ;;  %v612_v10 = vmul.f32 %v604_v3, %v2099_v39  ;;  %v2180_v39 = vld [vmem:[%s2577_s2 + $0x160] sm:$0xff] }
 0x232   :  { %v608_v60 = vadd.f32 %v607_v31, %v179_v59 }
 0x234   :  { %1317 = vtanh.f32 %v608_v60 }
 0x23a   :  { %v1318_v7 = vpop.eup %1317 }
 0x23b   :  { %v611_v8 = vmul.f32 %v1318_v7, %v610_v5 }
 0x23d   :  { %v2159_v11 = vadd.f32 %v612_v10, %v611_v8 }
 0x23f   :  { %636 = vmatmul.f32.vlgmr.msrb.gmra.mxu3 %v2159_v11  ;;  %656 = vmatmul.f32.vlgmr.msrb.gmra.mxu0 %v2159_v11 }
 0x240   :  { %676 = vmatmul.f32.vlgmr.msrb.gmra.mxu1 %v2159_v11  ;;  %888 = vmatpush.msrb.mxu3 %v2167_v15 }
 0x241   :  { %962 = vmatpush.msrb.mxu0 %v2173_v16  ;;  %982 = vmatpush.msrb.mxu1 %v1675_v36  ;;  %v2193_v36 = vld [vmem:[%s2577_s2 + $0x148] sm:$0xff] }
 0x242   :  { %889 = vmatpush.msrb.mxu3 %v2180_v39 }
 0x243   :  { %963 = vmatpush.msrb.mxu0 %v2186_v17  ;;  %983 = vmatpush.msrb.mxu1 %v1691_v40  ;;  %v2206_v40 = vld [vmem:[%s2577_s2 + $0x130] sm:$0xff] }
 0x244   :  { %890 = vmatpush.msrb.mxu3 %v2193_v36 }
 0x245   :  { %964 = vmatpush.msrb.mxu0 %v2199_v18  ;;  %984 = vmatpush.msrb.mxu1 %v1714_v45  ;;  %v2219_v45 = vld [vmem:[%s2577_s2 + $0x118] sm:$0xff] }
 0x246   :  { %891 = vmatpush.msrb.mxu3 %v2206_v40 }
 0x247   :  { %965 = vmatpush.msrb.mxu0 %v2212_v19  ;;  %985 = vmatpush.msrb.mxu1 %v1730_v47  ;;  %v2232_v47 = vld [vmem:[%s2577_s2 + $0x100] sm:$0xff] }
 0x248   :  { %892 = vmatpush.msrb.mxu3 %v2219_v45 }
 0x249   :  { %966 = vmatpush.msrb.mxu0 %v2225_v21  ;;  %986 = vmatpush.msrb.mxu1 %v1738_v48  ;;  %v2245_v48 = vld [vmem:[%s2577_s2 + $0xe8] sm:$0xff] }
 0x24a   :  { %893 = vmatpush.msrb.mxu3 %v2232_v47 }
 0x24b   :  { %967 = vmatpush.msrb.mxu0 %v2238_v22  ;;  %987 = vmatpush.msrb.mxu1 %v1747_v49  ;;  %v2258_v49 = vld [vmem:[%s2577_s2 + $0xd0] sm:$0xff] }
 0x24c   :  { %894 = vmatpush.msrb.mxu3 %v2245_v48 }
 0x24d   :  { %968 = vmatpush.msrb.mxu0 %v2251_v23  ;;  %988 = vmatpush.msrb.mxu1 %v1761_v51  ;;  %v2271_v51 = vld [vmem:[%s2577_s2 + $0xb8] sm:$0xff] }
 0x24e   :  { %895 = vmatpush.msrb.mxu3 %v2258_v49 }
 0x24f   :  { %969 = vmatpush.msrb.mxu0 %v2264_v24  ;;  %989 = vmatpush.msrb.mxu1 %v1773_v52  ;;  %v2284_v52 = vld [vmem:[%s2577_s2 + $0xa0] sm:$0xff] }
 0x250   :  { %896 = vmatpush.msrb.mxu3 %v2271_v51 }
 0x251   :  { %970 = vmatpush.msrb.mxu0 %v2277_v25  ;;  %990 = vmatpush.msrb.mxu1 %v1782_v53  ;;  %v2297_v53 = vld [vmem:[%s2577_s2 + $0x88] sm:$0xff] }
 0x252   :  { %897 = vmatpush.msrb.mxu3 %v2284_v52 }
 0x253   :  { %971 = vmatpush.msrb.mxu0 %v2290_v26  ;;  %991 = vmatpush.msrb.mxu1 %v1791_v54  ;;  %v2310_v54 = vld [vmem:[%s2577_s2 + $0x70] sm:$0xff] }
 0x254   :  { %898 = vmatpush.msrb.mxu3 %v2297_v53 }
 0x255   :  { %972 = vmatpush.msrb.mxu0 %v2303_v27  ;;  %992 = vmatpush.msrb.mxu1 %v1805_v56  ;;  %v2323_v56 = vld [vmem:[%s2577_s2 + $0x58] sm:$0xff] }
 0x256   :  { %899 = vmatpush.msrb.mxu3 %v2310_v54 }
 0x257   :  { %973 = vmatpush.msrb.mxu0 %v2316_v28  ;;  %993 = vmatpush.msrb.mxu1 %v1817_v57  ;;  %v2336_v57 = vld [vmem:[%s2577_s2 + $0x40] sm:$0xff] }
 0x258   :  { %900 = vmatpush.msrb.mxu3 %v2323_v56 }
 0x259   :  { %974 = vmatpush.msrb.mxu0 %v2329_v30  ;;  %994 = vmatpush.msrb.mxu1 %v2642_v1  ;;  %v2349_v1 = vld [vmem:[%s2577_s2 + $0x28] sm:$0xff] }
 0x25a   :  { %901 = vmatpush.msrb.mxu3 %v2336_v57 }
 0x25b   :  { %975 = vmatpush.msrb.mxu0 %v2342_v32  ;;  %995 = vmatpush.msrb.mxu1 %v2645_v6  ;;  %v2362_v6 = vld [vmem:[%s2577_s2 + $0x10] sm:$0xff] }
 0x25c   :  { %902 = vmatpush.msrb.mxu3 %v2349_v1 }
 0x25d   :  { %976 = vmatpush.msrb.mxu0 %v2355_v35  ;;  %996 = vmatpush.msrb.mxu1 %v2648_v9 }
 0x25e   :  { %903 = vmatpush.msrb.mxu3 %v2362_v6 }
 0x25f   :  { %977 = vmatpush.msrb.mxu0 %v2368_v38  ;;  %997 = vmatpush.msrb.mxu1 %v2651_v13 }
 0x2bc   :  { %v657_v9 = vpop.f32.mrf.mxu0 }
 0x2bd   :  { %v681_v63 = vadd.f32 %v657_v9, %v141_v50  ;;  %v677_v3 = vpop.f32.mrf.mxu1  ;;  %v2658_v9 = vld [vmem:[#allocation24_spill] sm:$0xff] }
 0x2be   :  { %v720_v8 = vadd.f32 %v2011_v33, %v677_v3 }
 0x2bf   :  { %v1277_v41 = vmul.f32 -1.442695, %v681_v63  ;;  %v182_v63 = vadd.f32 %v2658_v9, %v2014_v44 }
 0x2c1   :  { %1319 = vpow2.f32 %v1277_v41 }
 0x2c2   :  { %v637_v29 = vpop.f32.mrf.mxu3 }
 0x2c3   :  { %v680_v61 = vadd.f32 %v637_v29, %v2657_v2 }
 0x2c5   :  { %v1276_v0 = vmul.f32 -1.442695, %v680_v61 }
 0x2c7   :  { %v1320_v46 = vpop.eup %1319  ;;  %1321 = vpow2.f32 %v1276_v0 }
 0x2c8   :  { %v689_v34 = vadd.f32 1.0, %v1320_v46 }
 0x2ca   :  { %1323 = vrcp.f32 %v689_v34  ;;  %v716_v41 = vand.u32 2147483648, %v689_v34  ;;  %vm710_vm14 = vweird.f32 %v689_v34  ;;  %v714_v2 = vand.u32 2147483647, %v689_v34 }
 0x2cc   :  { %v717_v46 = vor.u32 1.1754944e-38, %v716_v41  ;;  %vm715_vm0 = vcmp.eq.f32.partialorder %v714_v2, 8.507059e+37 }
 0x2cd   :  { %v1322_v12 = vpop.eup %1321 }
 0x2ce   :  { %v688_v4 = vadd.f32 1.0, %v1322_v12 }
 0x2d0   :  { %1325 = vrcp.f32 %v688_v4  ;;  %v1324_v62 = vpop.eup %1323  ;;  %v701_v37 = vand.u32 2147483648, %v688_v4  ;;  %v699_v55 = vand.u32 2147483647, %v688_v4  ;;  %vm695_vm10 = vweird.f32 %v688_v4 }
 0x2d1   :  { %v706_v13 = vmul.f32 %v1324_v62, %v689_v34  ;;  %vm711_vm13 = vweird.f32 %v1324_v62  ;;  %v1405_v34 = vld [vmem:[%s2577_s2 + $0x170] sm:$0xff] }
 0x2d2   :  { %v702_v7 = vor.u32 1.1754944e-38, %v701_v37  ;;  %vm700_vm12 = vcmp.eq.f32.partialorder %v699_v55, 8.507059e+37  ;;  %vm712_vm15 = vmor %vm710_vm14, %vm711_vm13 }
 0x2d3   :  { %v707_v31 = vsub.f32 1.0, %v706_v13 }
 0x2d5   :  { %v708_v43 = vmul.f32 %v1324_v62, %v707_v31 }
 0x2d6   :  { %v1326_v20 = vpop.eup %1325 }
 0x2d7   :  { %v691_v59 = vmul.f32 %v1326_v20, %v688_v4  ;;  %vm696_vm9 = vweird.f32 %v1326_v20  ;;  %v709_v50 = vadd.f32 %v1324_v62, %v708_v43 }
 0x2d8   :  { %vm697_vm11 = vmor %vm695_vm10, %vm696_vm9 }
 0x2d9   :  { %v692_v42 = vsub.f32 1.0, %v691_v59  ;;  %v713_v0 = vsel %vm712_vm15, %v1324_v62, %v709_v50  ;;  %v2659_v62 = vld [vmem:[#allocation25_spill] sm:$0xff] }
 0x2da   :  { %v718_v12 = vsel %vm715_vm0, %v717_v46, %v713_v0 }
 0x2db   :  { %v693_v60 = vmul.f32 %v1326_v20, %v692_v42  ;;  %v724_v4 = vsub.f32 1.0, %v718_v12  ;;  %v726_v59 = vmul.f32 %v718_v12, %v2159_v11  ;;  %v1406_v11 = vld [vmem:[%s2577_s2 + $0x158] sm:$0xff]  ;;  %v144_v42 = vadd.f32 %v2659_v62, %v2652_v14 }
 0x2dd   :  { %v694_v5 = vadd.f32 %v1326_v20, %v693_v60 }
 0x2df   :  { %v698_v10 = vsel %vm697_vm11, %v1326_v20, %v694_v5 }
 0x2e0   :  { %v703_v58 = vsel %vm700_vm12, %v702_v7, %v698_v10 }
 0x2e1   :  { %v721_v29 = vmul.f32 %v720_v8, %v703_v58 }
 0x2e3   :  { %v722_v61 = vadd.f32 %v721_v29, %v182_v63 }
 0x2e5   :  { %1327 = vtanh.f32 %v722_v61 }
 0x2eb   :  { %v1328_v13 = vpop.eup %1327 }
 0x2ec   :  { %v725_v20 = vmul.f32 %v1328_v13, %v724_v4 }
 0x2ee   :  { %v2379_v31 = vadd.f32 %v726_v59, %v725_v20 }
 0x2f0   :  { %750 = vmatmul.f32.vlgmr.msrb.gmra.mxu2 %v2379_v31  ;;  %770 = vmatmul.f32.vlgmr.msra.gmra.mxu3 %v2379_v31 }
 0x2f1   :  { %790 = vmatmul.f32.vlgmr.msra.gmra.mxu0 %v2379_v31  ;;  %1002 = vmatpush.msrb.mxu2 %v2167_v15 }
 0x2f2   :  { %1076 = vmatpush.msra.mxu3 %v2173_v16  ;;  %1096 = vmatpush.msra.mxu0 %v1405_v34  ;;  %v1407_v16 = vld [vmem:[%s2577_s2 + $0x140] sm:$0xff] }
 0x2f3   :  { %1003 = vmatpush.msrb.mxu2 %v2180_v39 }
 0x2f4   :  { %1077 = vmatpush.msra.mxu3 %v2186_v17  ;;  %1097 = vmatpush.msra.mxu0 %v1406_v11  ;;  %v1408_v17 = vld [vmem:[%s2577_s2 + $0x128] sm:$0xff] }
 0x2f5   :  { %1004 = vmatpush.msrb.mxu2 %v2193_v36 }
 0x2f6   :  { %1078 = vmatpush.msra.mxu3 %v2199_v18  ;;  %1098 = vmatpush.msra.mxu0 %v1407_v16  ;;  %v1409_v18 = vld [vmem:[%s2577_s2 + $0x110] sm:$0xff]  ;;  %v2661_v16 = vld [vmem:[#allocation26_spill] sm:$0xff] }
 0x2f7   :  { %1005 = vmatpush.msrb.mxu2 %v2206_v40 }
 0x2f8   :  { %1079 = vmatpush.msra.mxu3 %v2212_v19  ;;  %1099 = vmatpush.msra.mxu0 %v1408_v17  ;;  %v1410_v19 = vld [vmem:[%s2577_s2 + $0xf8] sm:$0xff]  ;;  %v185_v17 = vadd.f32 %v2661_v16, %v2014_v44 }
 0x2f9   :  { %1006 = vmatpush.msrb.mxu2 %v2219_v45 }
 0x2fa   :  { %1080 = vmatpush.msra.mxu3 %v2225_v21  ;;  %1100 = vmatpush.msra.mxu0 %v1409_v18  ;;  %v1411_v21 = vld [vmem:[%s2577_s2 + $0xe0] sm:$0xff] }
 0x2fb   :  { %1007 = vmatpush.msrb.mxu2 %v2232_v47 }
 0x2fc   :  { %1081 = vmatpush.msra.mxu3 %v2238_v22  ;;  %1101 = vmatpush.msra.mxu0 %v1410_v19  ;;  %v1412_v22 = vld [vmem:[%s2577_s2 + $0xc8] sm:$0xff] }
 0x2fd   :  { %1008 = vmatpush.msrb.mxu2 %v2245_v48 }
 0x2fe   :  { %1082 = vmatpush.msra.mxu3 %v2251_v23  ;;  %1102 = vmatpush.msra.mxu0 %v1411_v21  ;;  %v1413_v23 = vld [vmem:[%s2577_s2 + $0xb0] sm:$0xff] }
 0x2ff   :  { %1009 = vmatpush.msrb.mxu2 %v2258_v49 }
 0x300   :  { %1083 = vmatpush.msra.mxu3 %v2264_v24  ;;  %1103 = vmatpush.msra.mxu0 %v1412_v22  ;;  %v1414_v24 = vld [vmem:[%s2577_s2 + $0x98] sm:$0xff] }
 0x301   :  { %1010 = vmatpush.msrb.mxu2 %v2271_v51 }
 0x302   :  { %1084 = vmatpush.msra.mxu3 %v2277_v25  ;;  %1104 = vmatpush.msra.mxu0 %v1413_v23  ;;  %v1415_v25 = vld [vmem:[%s2577_s2 + $0x80] sm:$0xff] }
 0x303   :  { %1011 = vmatpush.msrb.mxu2 %v2284_v52 }
 0x304   :  { %1085 = vmatpush.msra.mxu3 %v2290_v26  ;;  %1105 = vmatpush.msra.mxu0 %v1414_v24  ;;  %v1416_v26 = vld [vmem:[%s2577_s2 + $0x68] sm:$0xff] }
 0x305   :  { %1012 = vmatpush.msrb.mxu2 %v2297_v53 }
 0x306   :  { %1086 = vmatpush.msra.mxu3 %v2303_v27  ;;  %1106 = vmatpush.msra.mxu0 %v1415_v25  ;;  %v1417_v27 = vld [vmem:[%s2577_s2 + $0x50] sm:$0xff] }
 0x307   :  { %1013 = vmatpush.msrb.mxu2 %v2310_v54 }
 0x308   :  { %1087 = vmatpush.msra.mxu3 %v2316_v28  ;;  %1107 = vmatpush.msra.mxu0 %v1416_v26  ;;  %v1418_v28 = vld [vmem:[%s2577_s2 + $0x38] sm:$0xff] }
 0x309   :  { %1014 = vmatpush.msrb.mxu2 %v2323_v56 }
 0x30a   :  { %1088 = vmatpush.msra.mxu3 %v2329_v30  ;;  %1108 = vmatpush.msra.mxu0 %v1417_v27  ;;  %v1419_v30 = vld [vmem:[%s2577_s2 + $0x20] sm:$0xff] }
 0x30b   :  { %1015 = vmatpush.msrb.mxu2 %v2336_v57 }
 0x30c   :  { %1089 = vmatpush.msra.mxu3 %v2342_v32  ;;  %1109 = vmatpush.msra.mxu0 %v1418_v28  ;;  %v1420_v32 = vld [vmem:[%s2577_s2 + $0x8] sm:$0xff] }
 0x30d   :  { %1016 = vmatpush.msrb.mxu2 %v2349_v1 }
 0x30e   :  { %1090 = vmatpush.msra.mxu3 %v2355_v35  ;;  %1110 = vmatpush.msra.mxu0 %v1419_v30  ;;  %v2660_v35 = vld [vmem:[#allocation16_spill] sm:$0xff] }
 0x30f   :  { %1017 = vmatpush.msrb.mxu2 %v2362_v6 }
 0x310   :  { %1091 = vmatpush.msra.mxu3 %v2368_v38  ;;  %1111 = vmatpush.msra.mxu0 %v1420_v32 }
 0x36e   :  { %v791_v46 = vpop.f32.mrf.mxu0 }
 0x36f   :  { %v834_v20 = vadd.f32 %v2011_v33, %v791_v46 }
 0x373   :  { %v751_v37 = vpop.f32.mrf.mxu2  ;;  %v771_v60 = vpop.f32.mrf.mxu3 }
 0x374   :  { %v794_v55 = vadd.f32 %v751_v37, %v2660_v35  ;;  %v795_v43 = vadd.f32 %v771_v60, %v144_v42 }
 0x376   :  { %v1278_v3 = vmul.f32 -1.442695, %v794_v55  ;;  %v1279_v5 = vmul.f32 -1.442695, %v795_v43 }
 0x378   :  { %1329 = vpow2.f32 %v1278_v3 }
 0x379   :  { %1331 = vpow2.f32 %v1279_v5  ;;  %v2498_v5 = vld [vmem:[%s2579_s4] ss:$0 sm:$0xff] }
 0x37e   :  { %v1330_v7 = vpop.eup %1329 }
 0x37f   :  { %v1332_v8 = vpop.eup %1331  ;;  %v802_v38 = vadd.f32 1.0, %v1330_v7 }
 0x380   :  { %v803_v10 = vadd.f32 1.0, %v1332_v8  ;;  %v2664_v8 = vld [vmem:[#allocation28_spill] sm:$0xff] }
 0x381   :  { %1333 = vrcp.f32 %v802_v38  ;;  %v815_v29 = vand.u32 2147483648, %v802_v38  ;;  %v813_v0 = vand.u32 2147483647, %v802_v38  ;;  %vm809_vm2 = vweird.f32 %v802_v38 }
 0x382   :  { %1335 = vrcp.f32 %v803_v10  ;;  %v830_v18 = vand.u32 2147483648, %v803_v10  ;;  %vm824_vm6 = vweird.f32 %v803_v10  ;;  %v828_v21 = vand.u32 2147483647, %v803_v10 }
 0x383   :  { %v816_v13 = vor.u32 1.1754944e-38, %v815_v29  ;;  %vm814_vm4 = vcmp.eq.f32.partialorder %v813_v0, 8.507059e+37 }
 0x384   :  { %v831_v24 = vor.u32 1.1754944e-38, %v830_v18  ;;  %vm829_vm8 = vcmp.eq.f32.partialorder %v828_v21, 8.507059e+37 }
 0x387   :  { %v1334_v58 = vpop.eup %1333 }
 0x388   :  { %v1336_v50 = vpop.eup %1335  ;;  %v805_v9 = vmul.f32 %v1334_v58, %v802_v38  ;;  %vm810_vm1 = vweird.f32 %v1334_v58  ;;  %v188_v38 = vadd.f32 %v2664_v8, %v2014_v44  ;;  %v1199_v8 = vld [vmem:[%s2582_s5 + $0x78] sm:$0xff] }
 0x389   :  { %v820_v63 = vmul.f32 %v1336_v50, %v803_v10  ;;  %vm811_vm3 = vmor %vm809_vm2, %vm810_vm1  ;;  %vm825_vm5 = vweird.f32 %v1336_v50 }
 0x38a   :  { %v806_v41 = vsub.f32 1.0, %v805_v9  ;;  %vm826_vm7 = vmor %vm824_vm6, %vm825_vm5 }
 0x38b   :  { %v821_v2 = vsub.f32 1.0, %v820_v63 }
 0x38c   :  { %v807_v61 = vmul.f32 %v1334_v58, %v806_v41 }
 0x38d   :  { %v822_v12 = vmul.f32 %v1336_v50, %v821_v2 }
 0x38e   :  { %v808_v4 = vadd.f32 %v1334_v58, %v807_v61 }
 0x38f   :  { %v823_v11 = vadd.f32 %v1336_v50, %v822_v12 }
 0x390   :  { %v812_v59 = vsel %vm811_vm3, %v1334_v58, %v808_v4 }
 0x391   :  { %v817_v34 = vsel %vm814_vm4, %v816_v13, %v812_v59  ;;  %v827_v23 = vsel %vm826_vm7, %v1336_v50, %v823_v11  ;;  %v2665_v59 = vld [vmem:[#allocation29_spill] sm:$0xff] }
 0x392   :  { %v835_v19 = vmul.f32 %v834_v20, %v817_v34  ;;  %v832_v25 = vsel %vm829_vm8, %v831_v24, %v827_v23  ;;  %v150_v34 = vadd.f32 %v2665_v59, %v2652_v14  ;;  %v1189_v59 = vld [vmem:[%s2582_s5 + $0x28] sm:$0xff] }
 0x393   :  { %v838_v33 = vsub.f32 1.0, %v832_v25  ;;  %v840_v28 = vmul.f32 %v832_v25, %v2379_v31 }
 0x394   :  { %v836_v22 = vadd.f32 %v835_v19, %v185_v17  ;;  %v2666_v17 = vld [vmem:[#allocation18_spill] sm:$0xff] }
 0x396   :  { %1337 = vtanh.f32 %v836_v22 }
 0x39c   :  { %v1338_v26 = vpop.eup %1337 }
 0x39d   :  { %v839_v27 = vmul.f32 %v1338_v26, %v838_v33 }
 0x39f   :  { %v2471_v30 = vadd.f32 %v840_v28, %v839_v27 }
 0x3a1   :  { %864 = vmatmul.f32.vlgmr.msra.gmra.mxu1 %v2471_v30  ;;  %884 = vmatmul.f32.vlgmr.msra.gmra.mxu2 %v2471_v30 }
 0x3a2   :  { %904 = vmatmul.f32.vlgmr.msrb.gmra.mxu3 %v2471_v30  ;;  %1116 = vmatpush.msra.mxu1 %v2167_v15 }
 0x3a3   :  { %1204 = vmatpush.msra.mxu2 %v1199_v8 }
 0x3a4   :  { %1117 = vmatpush.msra.mxu1 %v2180_v39  ;;  %v2662_v39 = vld [vmem:[#allocation17_spill] sm:$0xff] }
 0x3a6   :  { %1118 = vmatpush.msra.mxu1 %v2193_v36 }
 0x3a8   :  { %1119 = vmatpush.msra.mxu1 %v2206_v40 }
 0x3aa   :  { %1120 = vmatpush.msra.mxu1 %v2219_v45  ;;  %v2663_v45 = vld [vmem:[#allocation27_spill] sm:$0xff] }
 0x3ac   :  { %1121 = vmatpush.msra.mxu1 %v2232_v47  ;;  %v147_v47 = vadd.f32 %v2663_v45, %v2652_v14 }
 0x3ae   :  { %1122 = vmatpush.msra.mxu1 %v2245_v48 }
 0x3b0   :  { %1123 = vmatpush.msra.mxu1 %v2258_v49 }
 0x3b2   :  { %1124 = vmatpush.msra.mxu1 %v2271_v51 }
 0x3b4   :  { %1125 = vmatpush.msra.mxu1 %v2284_v52 }
 0x3b6   :  { %1126 = vmatpush.msra.mxu1 %v2297_v53 }
 0x3b8   :  { %1127 = vmatpush.msra.mxu1 %v2310_v54 }
 0x3ba   :  { %1128 = vmatpush.msra.mxu1 %v2323_v56 }
 0x3bc   :  { %1129 = vmatpush.msra.mxu1 %v2336_v57 }
 0x3be   :  { %1130 = vmatpush.msra.mxu1 %v2349_v1 }
 0x3c0   :  { %1131 = vmatpush.msra.mxu1 %v2362_v6 }
 0x41e   :  { %v865_v15 = vpop.f32.mrf.mxu1 }
 0x41f   :  { %v908_v36 = vadd.f32 %v865_v15, %v2662_v39 }
 0x421   :  { %v1280_v40 = vmul.f32 -1.442695, %v908_v36 }
 0x423   :  { %1339 = vpow2.f32 %v1280_v40 }
 0x424   :  { %v885_v48 = vpop.f32.mrf.mxu2 }
 0x425   :  { %v909_v49 = vadd.f32 %v885_v48, %v147_v47  ;;  %v905_v37 = vpop.f32.mrf.mxu3 }
 0x426   :  { %v948_v7 = vadd.f32 %v2498_v5, %v905_v37 }
 0x427   :  { %v1281_v51 = vmul.f32 -1.442695, %v909_v49 }
 0x429   :  { %v1340_v52 = vpop.eup %1339  ;;  %1341 = vpow2.f32 %v1281_v51 }
 0x42a   :  { %v916_v53 = vadd.f32 1.0, %v1340_v52 }
 0x42c   :  { %1343 = vrcp.f32 %v916_v53  ;;  %v929_v31 = vand.u32 2147483648, %v916_v53  ;;  %v927_v62 = vand.u32 2147483647, %v916_v53  ;;  %vm923_vm10 = vweird.f32 %v916_v53 }
 0x42e   :  { %v930_v55 = vor.u32 1.1754944e-38, %v929_v31  ;;  %vm928_vm12 = vcmp.eq.f32.partialorder %v927_v62, 8.507059e+37 }
 0x42f   :  { %v1342_v54 = vpop.eup %1341 }
 0x430   :  { %v917_v56 = vadd.f32 1.0, %v1342_v54 }
 0x432   :  { %v1344_v57 = vpop.eup %1343  ;;  %1345 = vrcp.f32 %v917_v56  ;;  %v944_v9 = vand.u32 2147483648, %v917_v56  ;;  %v942_v63 = vand.u32 2147483647, %v917_v56  ;;  %vm938_vm14 = vweird.f32 %v917_v56 }
 0x433   :  { %v919_v1 = vmul.f32 %v1344_v57, %v916_v53  ;;  %vm924_vm9 = vweird.f32 %v1344_v57 }
 0x434   :  { %vm925_vm11 = vmor %vm923_vm10, %vm924_vm9  ;;  %v945_v61 = vor.u32 1.1754944e-38, %v944_v9  ;;  %vm943_vm0 = vcmp.eq.f32.partialorder %v942_v63, 8.507059e+37  ;;  %v2668_v9 = vld [vmem:[#allocation31_spill] sm:$0xff] }
 0x435   :  { %v920_v6 = vsub.f32 1.0, %v919_v1  ;;  %v153_v63 = vadd.f32 %v2668_v9, %v2652_v14  ;;  %v1191_v14 = vld [vmem:[%s2582_s5 + $0x38] sm:$0xff] }
 0x437   :  { %v921_v32 = vmul.f32 %v1344_v57, %v920_v6 }
 0x438   :  { %v1346_v42 = vpop.eup %1345 }
 0x439   :  { %v934_v60 = vmul.f32 %v1346_v42, %v917_v56  ;;  %v922_v35 = vadd.f32 %v1344_v57, %v921_v32  ;;  %vm939_vm13 = vweird.f32 %v1346_v42 }
 0x43a   :  { %vm940_vm15 = vmor %vm938_vm14, %vm939_vm13 }
 0x43b   :  { %v935_v43 = vsub.f32 1.0, %v934_v60  ;;  %v926_v3 = vsel %vm925_vm11, %v1344_v57, %v922_v35  ;;  %v2667_v57 = vld [vmem:[#allocation30_spill] sm:$0xff] }
 0x43c   :  { %v931_v10 = vsel %vm928_vm12, %v930_v55, %v926_v3  ;;  %v191_v1 = vadd.f32 %v2667_v57, %v2014_v44 }
 0x43d   :  { %v936_v58 = vmul.f32 %v1346_v42, %v935_v43  ;;  %v949_v50 = vmul.f32 %v948_v7, %v931_v10  ;;  %v1197_v10 = vld [vmem:[%s2582_s5 + $0x68] sm:$0xff] }
 0x43f   :  { %v950_v41 = vadd.f32 %v949_v50, %v188_v38  ;;  %v937_v29 = vadd.f32 %v1346_v42, %v936_v58  ;;  %v1198_v38 = vld [vmem:[%s2582_s5 + $0x70] sm:$0xff]  ;;  %v1196_v58 = vld [vmem:[%s2582_s5 + $0x60] sm:$0xff]  ;;  %v1195_v50 = vld [vmem:[%s2582_s5 + $0x58] sm:$0xff] }
 0x440   :  { %1205 = vmatpush.msra.mxu2 %v1198_v38 }
 0x441   :  { %1347 = vtanh.f32 %v950_v41  ;;  %v941_v2 = vsel %vm940_vm15, %v1346_v42, %v937_v29  ;;  %v1194_v41 = vld [vmem:[%s2582_s5 + $0x50] sm:$0xff] }
 0x442   :  { %v946_v0 = vsel %vm943_vm0, %v945_v61, %v941_v2  ;;  %1206 = vmatpush.msra.mxu2 %v1197_v10  ;;  %v1193_v61 = vld [vmem:[%s2582_s5 + $0x48] sm:$0xff] }
 0x443   :  { %v952_v46 = vsub.f32 1.0, %v946_v0  ;;  %v954_v13 = vmul.f32 %v946_v0, %v2471_v30 }
 0x444   :  { %1207 = vmatpush.msra.mxu2 %v1196_v58 }
 0x446   :  { %1208 = vmatpush.msra.mxu2 %v1195_v50 }
 0x447   :  { %v1348_v12 = vpop.eup %1347 }
 0x448   :  { %v953_v4 = vmul.f32 %v1348_v12, %v952_v46  ;;  %1209 = vmatpush.msra.mxu2 %v1194_v41  ;;  %v1192_v46 = vld [vmem:[%s2582_s5 + $0x40] sm:$0xff]  ;;  %v1190_v12 = vld [vmem:[%s2582_s5 + $0x30] sm:$0xff] }
 0x44a   :  { %v955_v20 = vadd.f32 %v954_v13, %v953_v4  ;;  %1210 = vmatpush.msra.mxu2 %v1193_v61  ;;  %v2669_v13 = vld [vmem:[#allocation19_spill] sm:$0xff] }
 0x44c   :  { %978 = vmatmul.f32.vlgmr.msrb.gmra.mxu0 %v955_v20  ;;  %998 = vmatmul.f32.vlgmr.msrb.gmra.mxu1 %v955_v20 }
 0x44d   :  { %1018 = vmatmul.f32.vlgmr.msrb.gmra.mxu2 %v955_v20 }
 0x44e   :  { %1211 = vmatpush.msra.mxu2 %v1192_v46 }
 0x450   :  { %1212 = vmatpush.msra.mxu2 %v1191_v14 }
 0x452   :  { %1213 = vmatpush.msra.mxu2 %v1190_v12 }
 0x454   :  { %1214 = vmatpush.msra.mxu2 %v1189_v59 }
 0x4c9   :  { %v979_v11 = vpop.f32.mrf.mxu0  ;;  %v999_v16 = vpop.f32.mrf.mxu1 }
 0x4ca   :  { %v1022_v18 = vadd.f32 %v979_v11, %v2666_v17  ;;  %v1023_v19 = vadd.f32 %v999_v16, %v150_v34  ;;  %v1188_v11 = vld [vmem:[%s2582_s5 + $0x20] sm:$0xff]  ;;  %v1187_v17 = vld [vmem:[%s2582_s5 + $0x18] sm:$0xff] }
 0x4cb   :  { %1215 = vmatpush.msra.mxu2 %v1188_v11 }
 0x4cc   :  { %v1282_v21 = vmul.f32 -1.442695, %v1022_v18  ;;  %v1283_v22 = vmul.f32 -1.442695, %v1023_v19  ;;  %v1186_v19 = vld [vmem:[%s2582_s5 + $0x10] sm:$0xff] }
 0x4cd   :  { %1216 = vmatpush.msra.mxu2 %v1187_v17 }
 0x4ce   :  { %1349 = vpow2.f32 %v1282_v21  ;;  %v1185_v21 = vld [vmem:[%s2582_s5 + $0x8] sm:$0xff] }
 0x4cf   :  { %1351 = vpow2.f32 %v1283_v22  ;;  %1217 = vmatpush.msra.mxu2 %v1186_v19 }
 0x4d0   :  { %v1019_v48 = vpop.f32.mrf.mxu2 }
 0x4d1   :  { %v1062_v53 = vadd.f32 %v2498_v5, %v1019_v48  ;;  %1218 = vmatpush.msra.mxu2 %v1185_v21 }
 0x4d4   :  { %v1350_v23 = vpop.eup %1349 }
 0x4d5   :  { %v1352_v24 = vpop.eup %1351  ;;  %v1030_v25 = vadd.f32 1.0, %v1350_v23  ;;  %v1184_v23 = vld [vmem:[%s2582_s5] sm:$0xff] }
 0x4d6   :  { %v1031_v33 = vadd.f32 1.0, %v1352_v24  ;;  %1219 = vmatpush.msra.mxu2 %v1184_v23 }
 0x4d7   :  { %1353 = vrcp.f32 %v1030_v25  ;;  %v1043_v36 = vand.u32 2147483648, %v1030_v25  ;;  %v1041_v45 = vand.u32 2147483647, %v1030_v25  ;;  %vm1037_vm2 = vweird.f32 %v1030_v25 }
 0x4d8   :  { %1355 = vrcp.f32 %v1031_v33  ;;  %v1058_v31 = vand.u32 2147483648, %v1031_v33  ;;  %vm1052_vm6 = vweird.f32 %v1031_v33  ;;  %v1056_v32 = vand.u32 2147483647, %v1031_v33 }
 0x4d9   :  { %v1044_v51 = vor.u32 1.1754944e-38, %v1043_v36  ;;  %vm1042_vm4 = vcmp.eq.f32.partialorder %v1041_v45, 8.507059e+37 }
 0x4da   :  { %v1059_v37 = vor.u32 1.1754944e-38, %v1058_v31  ;;  %vm1057_vm8 = vcmp.eq.f32.partialorder %v1056_v32, 8.507059e+37 }
 0x4dd   :  { %v1354_v26 = vpop.eup %1353 }
 0x4de   :  { %v1356_v27 = vpop.eup %1355  ;;  %v1033_v28 = vmul.f32 %v1354_v26, %v1030_v25  ;;  %vm1038_vm1 = vweird.f32 %v1354_v26 }
 0x4df   :  { %v1048_v30 = vmul.f32 %v1356_v27, %v1031_v33  ;;  %vm1039_vm3 = vmor %vm1037_vm2, %vm1038_vm1  ;;  %vm1053_vm5 = vweird.f32 %v1356_v27 }
 0x4e0   :  { %v1034_v15 = vsub.f32 1.0, %v1033_v28  ;;  %vm1054_vm7 = vmor %vm1052_vm6, %vm1053_vm5 }
 0x4e1   :  { %v1049_v39 = vsub.f32 1.0, %v1048_v30 }
 0x4e2   :  { %v1035_v40 = vmul.f32 %v1354_v26, %v1034_v15 }
 0x4e3   :  { %v1050_v47 = vmul.f32 %v1356_v27, %v1049_v39 }
 0x4e4   :  { %v1036_v49 = vadd.f32 %v1354_v26, %v1035_v40 }
 0x4e5   :  { %v1051_v56 = vadd.f32 %v1356_v27, %v1050_v47 }
 0x4e6   :  { %v1040_v52 = vsel %vm1039_vm3, %v1354_v26, %v1036_v49 }
 0x4e7   :  { %v1045_v54 = vsel %vm1042_vm4, %v1044_v51, %v1040_v52  ;;  %v1055_v42 = vsel %vm1054_vm7, %v1356_v27, %v1051_v56 }
 0x4e8   :  { %v1063_v6 = vmul.f32 %v1062_v53, %v1045_v54  ;;  %v1060_v60 = vsel %vm1057_vm8, %v1059_v37, %v1055_v42  ;;  %v2670_v54 = vld [vmem:[#allocation32_spill] sm:$0xff] }
 0x4e9   :  { %v1066_v35 = vsub.f32 1.0, %v1060_v60  ;;  %v1068_v3 = vmul.f32 %v1060_v60, %v955_v20  ;;  %v194_v56 = vadd.f32 %v2670_v54, %v2014_v44  ;;  %v1288_v44 = vld [vmem:[%s2581_s6] ss:$0 sm:$0xff] }
 0x4ea   :  { %v1064_v62 = vadd.f32 %v1063_v6, %v191_v1 }
 0x4ec   :  { %1357 = vtanh.f32 %v1064_v62 }
 0x4f2   :  { %v1358_v55 = vpop.eup %1357 }
 0x4f3   :  { %v1067_v43 = vmul.f32 %v1358_v55, %v1066_v35 }
 0x4f5   :  { %v2510_v7 = vadd.f32 %v1068_v3, %v1067_v43 }
 0x4f7   :  { %1092 = vmatmul.f32.vlgmr.msra.gmra.mxu3 %v2510_v7  ;;  %1112 = vmatmul.f32.vlgmr.msra.gmra.mxu0 %v2510_v7 }
 0x4f8   :  { %1132 = vmatmul.f32.vlgmr.msra.gmra.mxu1 %v2510_v7 }
 0x574   :  { %v1113_v29 = vpop.f32.mrf.mxu0 }
 0x575   :  { %v1137_v2 = vadd.f32 %v1113_v29, %v153_v63  ;;  %v1133_v45 = vpop.f32.mrf.mxu1 }
 0x576   :  { %v1176_v49 = vadd.f32 %v2498_v5, %v1133_v45 }
 0x577   :  { %v1285_v0 = vmul.f32 -1.442695, %v1137_v2 }
 0x579   :  { %1359 = vpow2.f32 %v1285_v0 }
 0x57a   :  { %v1093_v4 = vpop.f32.mrf.mxu3 }
 0x57b   :  { %v1136_v20 = vadd.f32 %v1093_v4, %v2669_v13 }
 0x57d   :  { %v1284_v34 = vmul.f32 -1.442695, %v1136_v20 }
 0x57f   :  { %v1360_v16 = vpop.eup %1359  ;;  %1361 = vpow2.f32 %v1284_v34 }
 0x580   :  { %v1145_v18 = vadd.f32 1.0, %v1360_v16 }
 0x582   :  { %1363 = vrcp.f32 %v1145_v18  ;;  %v1172_v57 = vand.u32 2147483648, %v1145_v18  ;;  %vm1166_vm14 = vweird.f32 %v1145_v18  ;;  %v1170_v6 = vand.u32 2147483647, %v1145_v18 }
 0x584   :  { %v1173_v62 = vor.u32 1.1754944e-38, %v1172_v57  ;;  %vm1171_vm0 = vcmp.eq.f32.partialorder %v1170_v6, 8.507059e+37 }
 0x585   :  { %v1362_v22 = vpop.eup %1361 }
 0x586   :  { %v1144_v24 = vadd.f32 1.0, %v1362_v22 }
 0x588   :  { %1365 = vrcp.f32 %v1144_v24  ;;  %v1364_v25 = vpop.eup %1363  ;;  %v1157_v15 = vand.u32 2147483648, %v1144_v24  ;;  %v1155_v36 = vand.u32 2147483647, %v1144_v24  ;;  %vm1151_vm10 = vweird.f32 %v1144_v24 }
 0x589   :  { %v1162_v33 = vmul.f32 %v1364_v25, %v1145_v18  ;;  %vm1167_vm13 = vweird.f32 %v1364_v25 }
 0x58a   :  { %v1158_v48 = vor.u32 1.1754944e-38, %v1157_v15  ;;  %vm1156_vm12 = vcmp.eq.f32.partialorder %v1155_v36, 8.507059e+37  ;;  %vm1168_vm15 = vmor %vm1166_vm14, %vm1167_vm13 }
 0x58b   :  { %v1163_v28 = vsub.f32 1.0, %v1162_v33 }
 0x58d   :  { %v1164_v40 = vmul.f32 %v1364_v25, %v1163_v28 }
 0x58e   :  { %v1366_v26 = vpop.eup %1365 }
 0x58f   :  { %v1147_v27 = vmul.f32 %v1366_v26, %v1144_v24  ;;  %vm1152_vm9 = vweird.f32 %v1366_v26  ;;  %v1165_v53 = vadd.f32 %v1364_v25, %v1164_v40 }
 0x590   :  { %vm1153_vm11 = vmor %vm1151_vm10, %vm1152_vm9 }
 0x591   :  { %v1148_v30 = vsub.f32 1.0, %v1147_v27  ;;  %v1169_v32 = vsel %vm1168_vm15, %v1364_v25, %v1165_v53 }
 0x592   :  { %v1174_v42 = vsel %vm1171_vm0, %v1173_v62, %v1169_v32 }
 0x593   :  { %v1149_v39 = vmul.f32 %v1366_v26, %v1148_v30  ;;  %v1180_v5 = vsub.f32 1.0, %v1174_v42  ;;  %v1182_v35 = vmul.f32 %v1174_v42, %v2510_v7 }
 0x595   :  { %v1150_v47 = vadd.f32 %v1366_v26, %v1149_v39 }
 0x597   :  { %v1154_v51 = vsel %vm1153_vm11, %v1366_v26, %v1150_v47 }
 0x598   :  { %v1159_v52 = vsel %vm1156_vm12, %v1158_v48, %v1154_v51 }
 0x599   :  { %v1177_v1 = vmul.f32 %v1176_v49, %v1159_v52 }
 0x59b   :  { %v1178_v31 = vadd.f32 %v1177_v1, %v194_v56 }
 0x59d   :  { %1367 = vtanh.f32 %v1178_v31 }
 0x5a3   :  { %v1368_v37 = vpop.eup %1367 }
 0x5a4   :  { %v1181_v60 = vmul.f32 %v1368_v37, %v1180_v5 }
 0x5a6   :  { %v1183_v55 = vadd.f32 %v1182_v35, %v1181_v60 }
 0x5a8   :  { %1220 = vmatmul.f32.vlgmr.msra.gmra.mxu2 %v1183_v55 }
 0x62b   :  { %v1221_v43 = vpop.f32.mrf.mxu2 }
 0x62c   :  { %v1222_v3 = vadd.f32 %v1288_v44, %v1221_v43 }
 0x62e   :  { %1224 = vmax.xlane.f32.xlu0 %v1222_v3 }
 0x6a1   :  { %v1225_v8 = vpop.xlane.xlu0 %1224 }
 0x6a2   :  { %v1226_v38 = vsub.f32 %v1222_v3, %v1225_v8 }
 0x6a4   :  { %v1227_v10 = vmul.f32 1.442695, %v1226_v38 }
 0x6a6   :  { %1369 = vpow2.f32 %v1227_v10 }
 0x6ac   :  { %v1370_v58 = vpop.eup %1369 }
 0x6ad   :  { %1229 = vadd.xlane.f32.xlu0 %v1370_v58 }
 0x720   :  { %v1230_v50 = vpop.xlane.xlu0 %1229 }
 0x721   :  { %1371 = vlog2.f32 %v1230_v50 }
 0x727   :  { %v1372_v9 = vpop.eup %1371 }
 0x728   :  { %v1232_v63 = vmul.f32 0.6931472, %v1372_v9 }
 0x72a   :  { %v1233_v7 = vsub.f32 %v1226_v38, %v1232_v63 }
 0x72c   :  { %1234 = vst [vmem:[%s2583_s7] sm:$0xff] %v1233_v7 }

</bundles_post_ra>
